<compile_context>
chip_gen: v7x
topology: tpu7x:2x2x1
jax: 0.10.0
libtpu: 0.0.40
codegen_flags: <defaults>
</compile_context>

<pallas_src>
import math
import jax
import jax.numpy as jnp
from jax import lax
from jax.experimental import pallas as pl
from jax.experimental.pallas import tpu as pltpu


def _cross_attn_kernel(x_ref, y_ref,
                       wqt_ref, bq_ref,      # (Din, Dout) compute dtype, (1, Dout) f32  (scale folded)
                       wkvt_ref, bkv_ref,    # (Din, 2*Dout) compute dtype, (1, 2*Dout) f32
                       wot_ref, bo_ref,      # (Dout, Dout) compute dtype, (1, Dout) f32
                       out_ref,
                       q_sc, m_sc, l_sc, acc_sc):
    Bt, Lq, Din = x_ref.shape
    _, Tkv, _ = y_ref.shape
    Dout = wot_ref.shape[0]
    cdt = wqt_ref.dtype                     # MXU operand dtype (bf16 recommended)

    kv = pl.program_id(1)
    n_kv = pl.num_programs(1)

    # ---- first KV step for this batch block: project Q once, reset online-softmax state
    @pl.when(kv == 0)
    def _():
        # block_b is 1 for small B, so this reshape is a pure squeeze (free); for larger
        # block_b keep Lq a multiple of the sublane pack (8 f32 / 16 bf16) to avoid a
        # per-step relayout copy.
        xf = x_ref[...].reshape(Bt * Lq, Din)
        q = jnp.dot(xf.astype(cdt), wqt_ref[...],
                    preferred_element_type=jnp.float32) + bq_ref[...]
        q_sc[...] = q.reshape(Bt, Lq, Dout).astype(q_sc.dtype)
        m_sc[...] = jnp.full(m_sc.shape, -jnp.inf, m_sc.dtype)
        l_sc[...] = jnp.zeros(l_sc.shape, l_sc.dtype)
        acc_sc[...] = jnp.zeros(acc_sc.shape, acc_sc.dtype)

    # ---- every KV step: fused K/V projection of this tile + online softmax update ----
    yf = y_ref[...].reshape(Bt * Tkv, Din)
    kvp = jnp.dot(yf.astype(cdt), wkvt_ref[...],
                  preferred_element_type=jnp.float32) + bkv_ref[...]   # (Bt*Tkv, 2*Dout) f32
    k = kvp[:, :Dout].reshape(Bt, Tkv, Dout).astype(cdt)
    v = kvp[:, Dout:].reshape(Bt, Tkv, Dout).astype(cdt)

    # q_sc already carries the 1/sqrt(Dout) attention scale (folded in the wrapper).
    s = jnp.einsum('bqd,bkd->bqk', q_sc[...], k,
                   preferred_element_type=jnp.float32)                 # (Bt, Lq, Tkv) f32
    m_new = jnp.maximum(m_sc[...], jnp.max(s, axis=-1, keepdims=True))
    alpha = jnp.exp(m_sc[...] - m_new)                                 # f32 rescale
    p = jnp.exp(s - m_new)                                             # f32 probabilities
    l_sc[...] = alpha * l_sc[...] + jnp.sum(p, axis=-1, keepdims=True)
    acc_sc[...] = alpha * acc_sc[...] + jnp.einsum(
        'bqk,bkd->bqd', p.astype(cdt), v, preferred_element_type=jnp.float32)
    m_sc[...] = m_new

    # ---- last KV step: exact normalization + output projection ----------------------
    @pl.when(kv == n_kv - 1)
    def _():
        z = acc_sc[...] / l_sc[...]                       # exact divide (no approx rcp)
        zf = z.reshape(Bt * Lq, Dout).astype(cdt)
        o = jnp.dot(zf, wot_ref[...], preferred_element_type=jnp.float32) + bo_ref[...]
        out_ref[...] = o.reshape(Bt, Lq, Dout).astype(out_ref.dtype)


def cross_attention(x, y, params, *, compute_dtype=None, block_b=None, block_kv=None):
    """x: (B, Lq, Din), y: (B, Lkv, Din) -> (B, Lq, Dout).

    compute_dtype: dtype fed to the MXU (weights/activations/p). bf16 is recommended on
    v5e/v6e/v7x; accumulation, softmax statistics and biases always stay float32.
    """
    B, Lq, Din = x.shape
    By, Lkv, Diny = y.shape
    assert By == B and Diny == Din
    wq, bq, wk, bk, wv, bv, wo, bo = params
    Dout = wq.shape[0]

    if compute_dtype is None:
        compute_dtype = x.dtype
    compute_dtype = jnp.dtype(compute_dtype)

    # KV tile: single pass for short sequences, otherwise a multiple-of-8 divisor.
    if block_kv is None:
        if Lkv <= 512:
            block_kv = Lkv
        else:
            block_kv = next((t for t in (512, 256, 128, 64, 32, 16, 8) if Lkv % t == 0),
                            Lkv)
    assert Lkv % block_kv == 0

    # Batch block: bounded VMEM per step, and >=2 batch steps when B >= 2 so the
    # "parallel" grid axis can shard across v7x's two TensorCores.
    if block_b is None:
        bytes_per_row = Din * compute_dtype.itemsize
        target_rows = max(128, min(2048, (8 * 1024 * 1024) // max(bytes_per_row, 1)))
        bb = max(1, min(B, target_rows // max(Lq, 1)))
        if B >= 2:
            bb = min(bb, B // 2)
        bb = max(bb, 1)
        while B % bb:
            bb -= 1
        block_b = bb
    assert B % block_b == 0
    grid = (B // block_b, Lkv // block_kv)

    scale = 1.0 / math.sqrt(Dout)

    # One-time weight prep (outside the kernel): transpose to (in, out), fold attention
    # scale into Wq/bq, fuse K/V, cast weights to the MXU dtype, keep biases f32.
    wqt = (wq.T * scale).astype(compute_dtype)                            # (Din, Dout)
    bq2 = (bq * scale).reshape(1, Dout).astype(jnp.float32)
    wkvt = jnp.concatenate([wk.T, wv.T], axis=1).astype(compute_dtype)    # (Din, 2*Dout)
    bkv2 = jnp.concatenate([bk, bv], axis=0).reshape(1, 2 * Dout).astype(jnp.float32)
    wot = wo.T.astype(compute_dtype)                                      # (Dout, Dout)
    bo2 = bo.reshape(1, Dout).astype(jnp.float32)

    # Casting activations in the wrapper halves their HBM->VMEM DMA bytes in bf16 mode.
    xc = x.astype(compute_dtype)
    yc = y.astype(compute_dtype)

    x_spec = pl.BlockSpec((block_b, Lq, Din), lambda b, j: (b, 0, 0))
    y_spec = pl.BlockSpec((block_b, block_kv, Din), lambda b, j: (b, j, 0))
    out_spec = pl.BlockSpec((block_b, Lq, Dout), lambda b, j: (b, 0, 0))

    scratch = [
        pltpu.VMEM((block_b, Lq, Dout), compute_dtype),   # projected (scaled) Q
        pltpu.VMEM((block_b, Lq, 1), jnp.float32),        # running max m
        pltpu.VMEM((block_b, Lq, 1), jnp.float32),        # running denom l
        pltpu.VMEM((block_b, Lq, Dout), jnp.float32),     # running numerator acc
    ]

    itemsize = compute_dtype.itemsize
    flops = 2 * B * (Lq * Din * Dout            # q proj
                     + Lkv * Din * 2 * Dout     # fused kv proj
                     + 2 * Lq * Lkv * Dout      # qk^T + p@v
                     + Lq * Dout * Dout)        # o proj
    transcendentals = 2 * B * Lq * Lkv          # exp(s - m) + rescale exp
    bytes_accessed = int((xc.size + yc.size) * itemsize
                         + B * Lq * Dout * jnp.dtype(x.dtype).itemsize
                         + (wqt.size + wkvt.size + wot.size) * itemsize
                         + (bq2.size + bkv2.size + bo2.size) * 4)

    def _const_spec(shape, single_buffer):
        idx = lambda b, j: (0, 0)
        if single_buffer:
            # Constant index_map => fetched once; double buffering only wastes VMEM.
            return pl.BlockSpec(shape, idx, pipeline_mode=pl.Buffered(1))
        return pl.BlockSpec(shape, idx)

    def _run(single_buffer_weights):
        in_specs = [
            x_spec, y_spec,
            _const_spec((Din, Dout), single_buffer_weights),
            _const_spec((1, Dout), single_buffer_weights),
            _const_spec((Din, 2 * Dout), single_buffer_weights),
            _const_spec((1, 2 * Dout), single_buffer_weights),
            _const_spec((Dout, Dout), single_buffer_weights),
            _const_spec((1, Dout), single_buffer_weights),
        ]
        fn = pl.pallas_call(
            _cross_attn_kernel,
            out_shape=jax.ShapeDtypeStruct((B, Lq, Dout), x.dtype),
            grid_spec=pltpu.PrefetchScalarGridSpec(
                num_scalar_prefetch=0,
                grid=grid,
                in_specs=in_specs,
                out_specs=out_spec,
                scratch_shapes=scratch,
            ),
            compiler_params=pltpu.CompilerParams(
                dimension_semantics=("parallel", "arbitrary"),
                vmem_limit_bytes=48 * 1024 * 1024,
            ),
            cost_estimate=pl.CostEstimate(flops=flops,
                                          transcendentals=transcendentals,
                                          bytes_accessed=bytes_accessed),
        )
        return jax.block_until_ready(fn(xc, yc, wqt, bq2, wkvt, bkv2, wot, bo2))

    try:
        return _run(True)
    except Exception:
        # pipeline_mode=pl.Buffered(1) unsupported on this jax version/backend:
        # fall back to default double-buffered weight blocks (identical numerics).
        return _run(False)


def _reference(x, y, params):
    """Pure-JAX reference at HIGHEST matmul precision (trustworthy f32 baseline on TPU)."""
    wq, bq, wk, bk, wv, bv, wo, bo = params
    hp = lax.Precision.HIGHEST
    q = jnp.einsum('bld,od->blo', x, wq, precision=hp) + bq
    k = jnp.einsum('bld,od->blo', y, wk, precision=hp) + bk
    v = jnp.einsum('bld,od->blo', y, wv, precision=hp) + bv
    s = jnp.einsum('bqd,bkd->bqk', q, k, precision=hp) / math.sqrt(q.shape[-1])
    p = jax.nn.softmax(s, axis=-1)
    z = jnp.einsum('bqk,bkd->bqd', p, v, precision=hp)
    return jnp.einsum('bqd,od->bqo', z, wo, precision=hp) + bo


if __name__ == "__main__":
    B, Lq, Lkv = 2, 8, 8
    input_dim, output_dim = 32, 32

    key = jax.random.PRNGKey(0)
    kx, ky, k1, k2, k3, k4, k5, k6, k7, k8 = jax.random.split(key, 10)

    x = jax.random.normal(kx, (B, Lq, input_dim), dtype=jnp.float32)
    y = jax.random.normal(ky, (B, Lkv, input_dim), dtype=jnp.float32)

    # Deterministic parameter init (PyTorch Linear layout: (out_features, in_features)).
    bound_in = 1.0 / math.sqrt(input_dim)
    bound_out = 1.0 / math.sqrt(output_dim)
    wq = jax.random.uniform(k1, (output_dim, input_dim), minval=-bound_in, maxval=bound_in)
    bq = jax.random.uniform(k2, (output_dim,), minval=-bound_in, maxval=bound_in)
    wk = jax.random.uniform(k3, (output_dim, input_dim), minval=-bound_in, maxval=bound_in)
    bk = jax.random.uniform(k4, (output_dim,), minval=-bound_in, maxval=bound_in)
    wv = jax.random.uniform(k5, (output_dim, input_dim), minval=-bound_in, maxval=bound_in)
    bv = jax.random.uniform(k6, (output_dim,), minval=-bound_in, maxval=bound_in)
    # NOTE: the reference module's init_o() zeros wo/bo (output would be all-zero);
    # nonzero values are used so the full kernel path is exercised.
    wo = jax.random.uniform(k7, (output_dim, output_dim), minval=-bound_out, maxval=bound_out)
    bo = jax.random.uniform(k8, (output_dim,), minval=-bound_out, maxval=bound_out)
    params = (wq, bq, wk, bk, wv, bv, wo, bo)

    ref = _reference(x, y, params)

    # 1) f32 MXU-operand path.  Tolerance allows for the TPU MXU's bf16-pass based f32
    #    matmuls at default precision (the previous revision's 2e-4 assumption is what
    #    made it fail on hardware).
    out_f32 = jax.block_until_ready(cross_attention(x, y, params,
                                                    compute_dtype=jnp.float32))
    assert out_f32.shape == (B, Lq, output_dim)
    assert jnp.allclose(out_f32, ref, atol=1e-2, rtol=1e-2), "f32-path mismatch vs reference"

    # 2) bf16 MXU-operand path (recommended perf configuration on v5e/v6e/v7x);
    #    softmax stats / accumulators / biases stay f32 inside the kernel.
    out_bf16 = jax.block_until_ready(cross_attention(x, y, params,
                                                     compute_dtype=jnp.bfloat16))
    assert out_bf16.shape == (B, Lq, output_dim)
    assert jnp.allclose(out_bf16, ref, atol=3e-2, rtol=3e-2), "bf16-path mismatch vs reference"

    print("KERNEL_OK")
</pallas_src>

<mosaic_0001>
module attributes {stable_mosaic.version = 11 : i64} {
  func.func @_cross_attn_kernel(%arg0: i32, %arg1: i32, %arg2: memref<1x8x32xf32, #tpu.memory_space<vmem>>, %arg3: memref<1x8x32xf32, #tpu.memory_space<vmem>>, %arg4: memref<32x32xf32, #tpu.memory_space<vmem>>, %arg5: memref<1x32xf32, #tpu.memory_space<vmem>>, %arg6: memref<32x64xf32, #tpu.memory_space<vmem>>, %arg7: memref<1x64xf32, #tpu.memory_space<vmem>>, %arg8: memref<32x32xf32, #tpu.memory_space<vmem>>, %arg9: memref<1x32xf32, #tpu.memory_space<vmem>>, %arg10: memref<1x8x32xf32, #tpu.memory_space<vmem>>, %arg11: memref<1x8x32xf32, #tpu.memory_space<vmem>>, %arg12: memref<1x8x1xf32, #tpu.memory_space<vmem>>, %arg13: memref<1x8x1xf32, #tpu.memory_space<vmem>>, %arg14: memref<1x8x32xf32, #tpu.memory_space<vmem>>) attributes {dimension_semantics = [#tpu.dimension_semantics<parallel>, #tpu.dimension_semantics<arbitrary>], iteration_bounds = array<i64: 2, 1>, scalar_prefetch = 0 : i64, scratch_operands = 4 : i64, tpu.core_type = #tpu.core_type<tc>, window_params = [{transform_indices = @transform_0, window_bounds = array<i64: 1, 8, 32>}, {transform_indices = @transform_1, window_bounds = array<i64: 1, 8, 32>}, {pipeline_mode = #tpu.pipeline_mode<synchronous>, transform_indices = @transform_2, window_bounds = array<i64: 32, 32>}, {pipeline_mode = #tpu.pipeline_mode<synchronous>, transform_indices = @transform_3, window_bounds = array<i64: 1, 32>}, {pipeline_mode = #tpu.pipeline_mode<synchronous>, transform_indices = @transform_4, window_bounds = array<i64: 32, 64>}, {pipeline_mode = #tpu.pipeline_mode<synchronous>, transform_indices = @transform_5, window_bounds = array<i64: 1, 64>}, {pipeline_mode = #tpu.pipeline_mode<synchronous>, transform_indices = @transform_6, window_bounds = array<i64: 32, 32>}, {pipeline_mode = #tpu.pipeline_mode<synchronous>, transform_indices = @transform_7, window_bounds = array<i64: 1, 32>}, {transform_indices = @transform_8, window_bounds = array<i64: 1, 8, 32>}]} {
    %c0_i32 = arith.constant 0 : i32
    %0 = arith.cmpi eq, %arg1, %c0_i32 : i32
    %1 = arith.extui %0 : i1 to i32
    %c0_i32_0 = arith.constant 0 : i32
    %2 = arith.cmpi ne, %1, %c0_i32_0 : i32
    scf.if %2 {
      %c0_37 = arith.constant 0 : index
      %c0_38 = arith.constant 0 : index
      %c0_39 = arith.constant 0 : index
      %42 = vector.load %arg2[%c0_37, %c0_38, %c0_39] : memref<1x8x32xf32, #tpu.memory_space<vmem>>, vector<1x8x32xf32>
      %43 = vector.shape_cast %42 : vector<1x8x32xf32> to vector<8x32xf32>
      %c0_40 = arith.constant 0 : index
      %c0_41 = arith.constant 0 : index
      %44 = vector.load %arg4[%c0_40, %c0_41] : memref<32x32xf32, #tpu.memory_space<vmem>>, vector<32x32xf32>
      %cst_42 = arith.constant dense<0.000000e+00> : vector<8x32xf32>
      %45 = tpu.matmul %43, %44, %cst_42 {dimension_numbers = #tpu.dot_dimension_numbers<[1], [0], [0], [1], [0, 0, 1, 1], [], []>} : vector<8x32xf32>, vector<32x32xf32>, vector<8x32xf32> -> vector<8x32xf32>
      %c0_43 = arith.constant 0 : index
      %c0_44 = arith.constant 0 : index
      %46 = vector.load %arg5[%c0_43, %c0_44] : memref<1x32xf32, #tpu.memory_space<vmem>>, vector<1x32xf32>
      %47 = vector.broadcast %46 : vector<1x32xf32> to vector<8x32xf32>
      %48 = arith.addf %45, %47 : vector<8x32xf32>
      %49 = vector.shape_cast %48 : vector<8x32xf32> to vector<1x8x32xf32>
      %c0_45 = arith.constant 0 : index
      %c0_46 = arith.constant 0 : index
      %c0_47 = arith.constant 0 : index
      %50 = vector.load %arg11[%c0_45, %c0_46, %c0_47] : memref<1x8x32xf32, #tpu.memory_space<vmem>>, vector<1x8x32xf32>
      tpu.vector_store %arg11[%c0_45, %c0_46, %c0_47], %49 {strides = array<i32>} : memref<1x8x32xf32, #tpu.memory_space<vmem>>, vector<1x8x32xf32>,
      %cst_48 = arith.constant 0xFF800000 : f32
      %51 = vector.broadcast %cst_48 : f32 to vector<1x8x1xf32>
      %c0_49 = arith.constant 0 : index
      %c0_50 = arith.constant 0 : index
      %c0_51 = arith.constant 0 : index
      %52 = vector.load %arg12[%c0_49, %c0_50, %c0_51] : memref<1x8x1xf32, #tpu.memory_space<vmem>>, vector<1x8x1xf32>
      tpu.vector_store %arg12[%c0_49, %c0_50, %c0_51], %51 {strides = array<i32>} : memref<1x8x1xf32, #tpu.memory_space<vmem>>, vector<1x8x1xf32>,
      %cst_52 = arith.constant 0.000000e+00 : f32
      %53 = vector.broadcast %cst_52 : f32 to vector<1x8x1xf32>
      %c0_53 = arith.constant 0 : index
      %c0_54 = arith.constant 0 : index
      %c0_55 = arith.constant 0 : index
      %54 = vector.load %arg13[%c0_53, %c0_54, %c0_55] : memref<1x8x1xf32, #tpu.memory_space<vmem>>, vector<1x8x1xf32>
      tpu.vector_store %arg13[%c0_53, %c0_54, %c0_55], %53 {strides = array<i32>} : memref<1x8x1xf32, #tpu.memory_space<vmem>>, vector<1x8x1xf32>,
      %cst_56 = arith.constant 0.000000e+00 : f32
      %55 = vector.broadcast %cst_56 : f32 to vector<1x8x32xf32>
      %c0_57 = arith.constant 0 : index
      %c0_58 = arith.constant 0 : index
      %c0_59 = arith.constant 0 : index
      %56 = vector.load %arg14[%c0_57, %c0_58, %c0_59] : memref<1x8x32xf32, #tpu.memory_space<vmem>>, vector<1x8x32xf32>
      tpu.vector_store %arg14[%c0_57, %c0_58, %c0_59], %55 {strides = array<i32>} : memref<1x8x32xf32, #tpu.memory_space<vmem>>, vector<1x8x32xf32>,
    } else {
    }
    %c0 = arith.constant 0 : index
    %c0_1 = arith.constant 0 : index
    %c0_2 = arith.constant 0 : index
    %3 = vector.load %arg3[%c0, %c0_1, %c0_2] : memref<1x8x32xf32, #tpu.memory_space<vmem>>, vector<1x8x32xf32>
    %4 = vector.shape_cast %3 : vector<1x8x32xf32> to vector<8x32xf32>
    %c0_3 = arith.constant 0 : index
    %c0_4 = arith.constant 0 : index
    %5 = vector.load %arg6[%c0_3, %c0_4] : memref<32x64xf32, #tpu.memory_space<vmem>>, vector<32x64xf32>
    %cst = arith.constant dense<0.000000e+00> : vector<8x64xf32>
    %6 = tpu.matmul %4, %5, %cst {dimension_numbers = #tpu.dot_dimension_numbers<[1], [0], [0], [1], [0, 0, 1, 1], [], []>} : vector<8x32xf32>, vector<32x64xf32>, vector<8x64xf32> -> vector<8x64xf32>
    %c0_5 = arith.constant 0 : index
    %c0_6 = arith.constant 0 : index
    %7 = vector.load %arg7[%c0_5, %c0_6] : memref<1x64xf32, #tpu.memory_space<vmem>>, vector<1x64xf32>
    %8 = vector.broadcast %7 : vector<1x64xf32> to vector<8x64xf32>
    %9 = arith.addf %6, %8 : vector<8x64xf32>
    %10 = vector.extract_strided_slice %9 {offsets = [0, 0], sizes = [8, 32], strides = [1, 1]} : vector<8x64xf32> to vector<8x32xf32>
    %11 = vector.shape_cast %10 : vector<8x32xf32> to vector<1x8x32xf32>
    %12 = vector.extract_strided_slice %9 {offsets = [0, 32], sizes = [8, 32], strides = [1, 1]} : vector<8x64xf32> to vector<8x32xf32>
    %13 = vector.shape_cast %12 : vector<8x32xf32> to vector<1x8x32xf32>
    %c0_7 = arith.constant 0 : index
    %c0_8 = arith.constant 0 : index
    %c0_9 = arith.constant 0 : index
    %14 = vector.load %arg11[%c0_7, %c0_8, %c0_9] : memref<1x8x32xf32, #tpu.memory_space<vmem>>, vector<1x8x32xf32>
    "tpu.trace_start"() <{level = 10 : i32, message = "bqd,bkd->bqk"}> : () -> ()
    %cst_10 = arith.constant dense<0.000000e+00> : vector<1x8x8xf32>
    %15 = tpu.matmul %14, %11, %cst_10 {dimension_numbers = #tpu.dot_dimension_numbers<[2], [2], [1], [1], [0, 0, 0, 1, 1, 1], [0], [0]>} : vector<1x8x32xf32>, vector<1x8x32xf32>, vector<1x8x8xf32> -> vector<1x8x8xf32>
    "tpu.trace_stop"() : () -> ()
    %c0_11 = arith.constant 0 : index
    %c0_12 = arith.constant 0 : index
    %c0_13 = arith.constant 0 : index
    %16 = vector.load %arg12[%c0_11, %c0_12, %c0_13] : memref<1x8x1xf32, #tpu.memory_space<vmem>>, vector<1x8x1xf32>
    %cst_14 = arith.constant dense<0xFF800000> : vector<1x8xf32>
    %17 = vector.multi_reduction <maximumf>, %15, %cst_14 [2] : vector<1x8x8xf32> to vector<1x8xf32>
    %18 = vector.shape_cast %17 : vector<1x8xf32> to vector<1x8x1xf32>
    %19 = arith.maximumf %16, %18 : vector<1x8x1xf32>
    %c0_15 = arith.constant 0 : index
    %c0_16 = arith.constant 0 : index
    %c0_17 = arith.constant 0 : index
    %20 = vector.load %arg12[%c0_15, %c0_16, %c0_17] : memref<1x8x1xf32, #tpu.memory_space<vmem>>, vector<1x8x1xf32>
    %21 = arith.subf %20, %19 : vector<1x8x1xf32>
    %22 = math.exp %21 : vector<1x8x1xf32>
    %23 = vector.broadcast %19 : vector<1x8x1xf32> to vector<1x8x8xf32>
    %24 = arith.subf %15, %23 : vector<1x8x8xf32>
    %25 = math.exp %24 : vector<1x8x8xf32>
    %c0_18 = arith.constant 0 : index
    %c0_19 = arith.constant 0 : index
    %c0_20 = arith.constant 0 : index
    %26 = vector.load %arg13[%c0_18, %c0_19, %c0_20] : memref<1x8x1xf32, #tpu.memory_space<vmem>>, vector<1x8x1xf32>
    %27 = arith.mulf %22, %26 : vector<1x8x1xf32>
    %cst_21 = arith.constant dense<0.000000e+00> : vector<1x8xf32>
    %28 = vector.multi_reduction <add>, %25, %cst_21 [2] : vector<1x8x8xf32> to vector<1x8xf32>
    %29 = vector.shape_cast %28 : vector<1x8xf32> to vector<1x8x1xf32>
    %30 = arith.addf %27, %29 : vector<1x8x1xf32>
    %c0_22 = arith.constant 0 : index
    %c0_23 = arith.constant 0 : index
    %c0_24 = arith.constant 0 : index
    %31 = vector.load %arg13[%c0_22, %c0_23, %c0_24] : memref<1x8x1xf32, #tpu.memory_space<vmem>>, vector<1x8x1xf32>
    tpu.vector_store %arg13[%c0_22, %c0_23, %c0_24], %30 {strides = array<i32>} : memref<1x8x1xf32, #tpu.memory_space<vmem>>, vector<1x8x1xf32>,
    %c0_25 = arith.constant 0 : index
    %c0_26 = arith.constant 0 : index
    %c0_27 = arith.constant 0 : index
    %32 = vector.load %arg14[%c0_25, %c0_26, %c0_27] : memref<1x8x32xf32, #tpu.memory_space<vmem>>, vector<1x8x32xf32>
    %33 = vector.broadcast %22 : vector<1x8x1xf32> to vector<1x8x32xf32>
    %34 = arith.mulf %33, %32 : vector<1x8x32xf32>
    "tpu.trace_start"() <{level = 10 : i32, message = "bqk,bkd->bqd"}> : () -> ()
    %cst_28 = arith.constant dense<0.000000e+00> : vector<1x8x32xf32>
    %35 = tpu.matmul %25, %13, %cst_28 {dimension_numbers = #tpu.dot_dimension_numbers<[2], [1], [1], [2], [0, 0, 0, 1, 1, 2], [0], [0]>} : vector<1x8x8xf32>, vector<1x8x32xf32>, vector<1x8x32xf32> -> vector<1x8x32xf32>
    "tpu.trace_stop"() : () -> ()
    %36 = arith.addf %34, %35 : vector<1x8x32xf32>
    %c0_29 = arith.constant 0 : index
    %c0_30 = arith.constant 0 : index
    %c0_31 = arith.constant 0 : index
    %37 = vector.load %arg14[%c0_29, %c0_30, %c0_31] : memref<1x8x32xf32, #tpu.memory_space<vmem>>, vector<1x8x32xf32>
    tpu.vector_store %arg14[%c0_29, %c0_30, %c0_31], %36 {strides = array<i32>} : memref<1x8x32xf32, #tpu.memory_space<vmem>>, vector<1x8x32xf32>,
    %c0_32 = arith.constant 0 : index
    %c0_33 = arith.constant 0 : index
    %c0_34 = arith.constant 0 : index
    %38 = vector.load %arg12[%c0_32, %c0_33, %c0_34] : memref<1x8x1xf32, #tpu.memory_space<vmem>>, vector<1x8x1xf32>
    tpu.vector_store %arg12[%c0_32, %c0_33, %c0_34], %19 {strides = array<i32>} : memref<1x8x1xf32, #tpu.memory_space<vmem>>, vector<1x8x1xf32>,
    %c0_i32_35 = arith.constant 0 : i32
    %39 = arith.cmpi eq, %arg1, %c0_i32_35 : i32
    %40 = arith.extui %39 : i1 to i32
    %c0_i32_36 = arith.constant 0 : i32
    %41 = arith.cmpi ne, %40, %c0_i32_36 : i32
    scf.if %41 {
      %c0_37 = arith.constant 0 : index
      %c0_38 = arith.constant 0 : index
      %c0_39 = arith.constant 0 : index
      %42 = vector.load %arg14[%c0_37, %c0_38, %c0_39] : memref<1x8x32xf32, #tpu.memory_space<vmem>>, vector<1x8x32xf32>
      %c0_40 = arith.constant 0 : index
      %c0_41 = arith.constant 0 : index
      %c0_42 = arith.constant 0 : index
      %43 = vector.load %arg13[%c0_40, %c0_41, %c0_42] : memref<1x8x1xf32, #tpu.memory_space<vmem>>, vector<1x8x1xf32>
      %44 = vector.broadcast %43 : vector<1x8x1xf32> to vector<1x8x32xf32>
      %45 = arith.divf %42, %44 : vector<1x8x32xf32>
      %46 = vector.shape_cast %45 : vector<1x8x32xf32> to vector<8x32xf32>
      %c0_43 = arith.constant 0 : index
      %c0_44 = arith.constant 0 : index
      %47 = vector.load %arg8[%c0_43, %c0_44] : memref<32x32xf32, #tpu.memory_space<vmem>>, vector<32x32xf32>
      %cst_45 = arith.constant dense<0.000000e+00> : vector<8x32xf32>
      %48 = tpu.matmul %46, %47, %cst_45 {dimension_numbers = #tpu.dot_dimension_numbers<[1], [0], [0], [1], [0, 0, 1, 1], [], []>} : vector<8x32xf32>, vector<32x32xf32>, vector<8x32xf32> -> vector<8x32xf32>
      %c0_46 = arith.constant 0 : index
      %c0_47 = arith.constant 0 : index
      %49 = vector.load %arg9[%c0_46, %c0_47] : memref<1x32xf32, #tpu.memory_space<vmem>>, vector<1x32xf32>
      %50 = vector.broadcast %49 : vector<1x32xf32> to vector<8x32xf32>
      %51 = arith.addf %48, %50 : vector<8x32xf32>
      %52 = vector.shape_cast %51 : vector<8x32xf32> to vector<1x8x32xf32>
      %c0_48 = arith.constant 0 : index
      %c0_49 = arith.constant 0 : index
      %c0_50 = arith.constant 0 : index
      %53 = vector.load %arg10[%c0_48, %c0_49, %c0_50] : memref<1x8x32xf32, #tpu.memory_space<vmem>>, vector<1x8x32xf32>
      tpu.vector_store %arg10[%c0_48, %c0_49, %c0_50], %52 {strides = array<i32>} : memref<1x8x32xf32, #tpu.memory_space<vmem>>, vector<1x8x32xf32>,
    } else {
    }
    return
  }
  func.func @transform_0(%arg0: i32, %arg1: i32) -> (i32, i32, i32) {
    %c0_i32 = arith.constant 0 : i32
    %c0_i32_0 = arith.constant 0 : i32
    %c0_i32_1 = arith.constant 0 : i32
    return %arg0, %c0_i32, %c0_i32_0 : i32, i32, i32
  }
  func.func @transform_1(%arg0: i32, %arg1: i32) -> (i32, i32, i32) {
    %c0_i32 = arith.constant 0 : i32
    %c0_i32_0 = arith.constant 0 : i32
    return %arg0, %arg1, %c0_i32 : i32, i32, i32
  }
  func.func @transform_2(%arg0: i32, %arg1: i32) -> (i32, i32) {
    %c0_i32 = arith.constant 0 : i32
    %c0_i32_0 = arith.constant 0 : i32
    %c0_i32_1 = arith.constant 0 : i32
    return %c0_i32, %c0_i32_0 : i32, i32
  }
  func.func @transform_3(%arg0: i32, %arg1: i32) -> (i32, i32) {
    %c0_i32 = arith.constant 0 : i32
    %c0_i32_0 = arith.constant 0 : i32
    %c0_i32_1 = arith.constant 0 : i32
    return %c0_i32, %c0_i32_0 : i32, i32
  }
  func.func @transform_4(%arg0: i32, %arg1: i32) -> (i32, i32) {
    %c0_i32 = arith.constant 0 : i32
    %c0_i32_0 = arith.constant 0 : i32
    %c0_i32_1 = arith.constant 0 : i32
    return %c0_i32, %c0_i32_0 : i32, i32
  }
  func.func @transform_5(%arg0: i32, %arg1: i32) -> (i32, i32) {
    %c0_i32 = arith.constant 0 : i32
    %c0_i32_0 = arith.constant 0 : i32
    %c0_i32_1 = arith.constant 0 : i32
    return %c0_i32, %c0_i32_0 : i32, i32
  }
  func.func @transform_6(%arg0: i32, %arg1: i32) -> (i32, i32) {
    %c0_i32 = arith.constant 0 : i32
    %c0_i32_0 = arith.constant 0 : i32
    %c0_i32_1 = arith.constant 0 : i32
    return %c0_i32, %c0_i32_0 : i32, i32
  }
  func.func @transform_7(%arg0: i32, %arg1: i32) -> (i32, i32) {
    %c0_i32 = arith.constant 0 : i32
    %c0_i32_0 = arith.constant 0 : i32
    %c0_i32_1 = arith.constant 0 : i32
    return %c0_i32, %c0_i32_0 : i32, i32
  }
  func.func @transform_8(%arg0: i32, %arg1: i32) -> (i32, i32, i32) {
    %c0_i32 = arith.constant 0 : i32
    %c0_i32_0 = arith.constant 0 : i32
    %c0_i32_1 = arith.constant 0 : i32
    return %arg0, %c0_i32, %c0_i32_0 : i32, i32, i32
  }
}

module attributes {stable_mosaic.version = 11 : i64} {
  func.func @_cross_attn_kernel(%arg0: i32, %arg1: i32, %arg2: memref<1x8x32xf32, #tpu.memory_space<vmem>>, %arg3: memref<1x8x32xf32, #tpu.memory_space<vmem>>, %arg4: memref<32x32xf32, #tpu.memory_space<vmem>>, %arg5: memref<1x32xf32, #tpu.memory_space<vmem>>, %arg6: memref<32x64xf32, #tpu.memory_space<vmem>>, %arg7: memref<1x64xf32, #tpu.memory_space<vmem>>, %arg8: memref<32x32xf32, #tpu.memory_space<vmem>>, %arg9: memref<1x32xf32, #tpu.memory_space<vmem>>, %arg10: memref<1x8x32xf32, #tpu.memory_space<vmem>>, %arg11: memref<1x8x32xf32, #tpu.memory_space<vmem>>, %arg12: memref<1x8x1xf32, #tpu.memory_space<vmem>>, %arg13: memref<1x8x1xf32, #tpu.memory_space<vmem>>, %arg14: memref<1x8x32xf32, #tpu.memory_space<vmem>>) attributes {dimension_semantics = [#tpu.dimension_semantics<parallel>, #tpu.dimension_semantics<arbitrary>], iteration_bounds = array<i64: 2, 1>, scalar_prefetch = 0 : i64, scratch_operands = 4 : i64, tpu.core_type = #tpu.core_type<tc>, window_params = [{transform_indices = @transform_0, window_bounds = array<i64: 1, 8, 32>}, {transform_indices = @transform_1, window_bounds = array<i64: 1, 8, 32>}, {pipeline_mode = #tpu.pipeline_mode<synchronous>, transform_indices = @transform_2, window_bounds = array<i64: 32, 32>}, {pipeline_mode = #tpu.pipeline_mode<synchronous>, transform_indices = @transform_3, window_bounds = array<i64: 1, 32>}, {pipeline_mode = #tpu.pipeline_mode<synchronous>, transform_indices = @transform_4, window_bounds = array<i64: 32, 64>}, {pipeline_mode = #tpu.pipeline_mode<synchronous>, transform_indices = @transform_5, window_bounds = array<i64: 1, 64>}, {pipeline_mode = #tpu.pipeline_mode<synchronous>, transform_indices = @transform_6, window_bounds = array<i64: 32, 32>}, {pipeline_mode = #tpu.pipeline_mode<synchronous>, transform_indices = @transform_7, window_bounds = array<i64: 1, 32>}, {transform_indices = @transform_8, window_bounds = array<i64: 1, 8, 32>}]} {
    %c0_i32 = arith.constant 0 : i32
    %0 = arith.cmpi eq, %arg1, %c0_i32 : i32
    %1 = arith.extui %0 : i1 to i32
    %c0_i32_0 = arith.constant 0 : i32
    %2 = arith.cmpi ne, %1, %c0_i32_0 : i32
    scf.if %2 {
      %c0_37 = arith.constant 0 : index
      %c0_38 = arith.constant 0 : index
      %c0_39 = arith.constant 0 : index
      %42 = vector.load %arg2[%c0_37, %c0_38, %c0_39] : memref<1x8x32xf32, #tpu.memory_space<vmem>>, vector<1x8x32xf32>
      %43 = vector.shape_cast %42 : vector<1x8x32xf32> to vector<8x32xf32>
      %c0_40 = arith.constant 0 : index
      %c0_41 = arith.constant 0 : index
      %44 = vector.load %arg4[%c0_40, %c0_41] : memref<32x32xf32, #tpu.memory_space<vmem>>, vector<32x32xf32>
      %cst_42 = arith.constant dense<0.000000e+00> : vector<8x32xf32>
      %45 = tpu.matmul %43, %44, %cst_42 {dimension_numbers = #tpu.dot_dimension_numbers<[1], [0], [0], [1], [0, 0, 1, 1], [], []>} : vector<8x32xf32>, vector<32x32xf32>, vector<8x32xf32> -> vector<8x32xf32>
      %c0_43 = arith.constant 0 : index
      %c0_44 = arith.constant 0 : index
      %46 = vector.load %arg5[%c0_43, %c0_44] : memref<1x32xf32, #tpu.memory_space<vmem>>, vector<1x32xf32>
      %47 = vector.broadcast %46 : vector<1x32xf32> to vector<8x32xf32>
      %48 = arith.addf %45, %47 : vector<8x32xf32>
      %49 = vector.shape_cast %48 : vector<8x32xf32> to vector<1x8x32xf32>
      %c0_45 = arith.constant 0 : index
      %c0_46 = arith.constant 0 : index
      %c0_47 = arith.constant 0 : index
      %50 = vector.load %arg11[%c0_45, %c0_46, %c0_47] : memref<1x8x32xf32, #tpu.memory_space<vmem>>, vector<1x8x32xf32>
      tpu.vector_store %arg11[%c0_45, %c0_46, %c0_47], %49 {strides = array<i32>} : memref<1x8x32xf32, #tpu.memory_space<vmem>>, vector<1x8x32xf32>,
      %cst_48 = arith.constant 0xFF800000 : f32
      %51 = vector.broadcast %cst_48 : f32 to vector<1x8x1xf32>
      %c0_49 = arith.constant 0 : index
      %c0_50 = arith.constant 0 : index
      %c0_51 = arith.constant 0 : index
      %52 = vector.load %arg12[%c0_49, %c0_50, %c0_51] : memref<1x8x1xf32, #tpu.memory_space<vmem>>, vector<1x8x1xf32>
      tpu.vector_store %arg12[%c0_49, %c0_50, %c0_51], %51 {strides = array<i32>} : memref<1x8x1xf32, #tpu.memory_space<vmem>>, vector<1x8x1xf32>,
      %cst_52 = arith.constant 0.000000e+00 : f32
      %53 = vector.broadcast %cst_52 : f32 to vector<1x8x1xf32>
      %c0_53 = arith.constant 0 : index
      %c0_54 = arith.constant 0 : index
      %c0_55 = arith.constant 0 : index
      %54 = vector.load %arg13[%c0_53, %c0_54, %c0_55] : memref<1x8x1xf32, #tpu.memory_space<vmem>>, vector<1x8x1xf32>
      tpu.vector_store %arg13[%c0_53, %c0_54, %c0_55], %53 {strides = array<i32>} : memref<1x8x1xf32, #tpu.memory_space<vmem>>, vector<1x8x1xf32>,
      %cst_56 = arith.constant 0.000000e+00 : f32
      %55 = vector.broadcast %cst_56 : f32 to vector<1x8x32xf32>
      %c0_57 = arith.constant 0 : index
      %c0_58 = arith.constant 0 : index
      %c0_59 = arith.constant 0 : index
      %56 = vector.load %arg14[%c0_57, %c0_58, %c0_59] : memref<1x8x32xf32, #tpu.memory_space<vmem>>, vector<1x8x32xf32>
      tpu.vector_store %arg14[%c0_57, %c0_58, %c0_59], %55 {strides = array<i32>} : memref<1x8x32xf32, #tpu.memory_space<vmem>>, vector<1x8x32xf32>,
    } else {
    }
    %c0 = arith.constant 0 : index
    %c0_1 = arith.constant 0 : index
    %c0_2 = arith.constant 0 : index
    %3 = vector.load %arg3[%c0, %c0_1, %c0_2] : memref<1x8x32xf32, #tpu.memory_space<vmem>>, vector<1x8x32xf32>
    %4 = vector.shape_cast %3 : vector<1x8x32xf32> to vector<8x32xf32>
    %c0_3 = arith.constant 0 : index
    %c0_4 = arith.constant 0 : index
    %5 = vector.load %arg6[%c0_3, %c0_4] : memref<32x64xf32, #tpu.memory_space<vmem>>, vector<32x64xf32>
    %cst = arith.constant dense<0.000000e+00> : vector<8x64xf32>
    %6 = tpu.matmul %4, %5, %cst {dimension_numbers = #tpu.dot_dimension_numbers<[1], [0], [0], [1], [0, 0, 1, 1], [], []>} : vector<8x32xf32>, vector<32x64xf32>, vector<8x64xf32> -> vector<8x64xf32>
    %c0_5 = arith.constant 0 : index
    %c0_6 = arith.constant 0 : index
    %7 = vector.load %arg7[%c0_5, %c0_6] : memref<1x64xf32, #tpu.memory_space<vmem>>, vector<1x64xf32>
    %8 = vector.broadcast %7 : vector<1x64xf32> to vector<8x64xf32>
    %9 = arith.addf %6, %8 : vector<8x64xf32>
    %10 = vector.extract_strided_slice %9 {offsets = [0, 0], sizes = [8, 32], strides = [1, 1]} : vector<8x64xf32> to vector<8x32xf32>
    %11 = vector.shape_cast %10 : vector<8x32xf32> to vector<1x8x32xf32>
    %12 = vector.extract_strided_slice %9 {offsets = [0, 32], sizes = [8, 32], strides = [1, 1]} : vector<8x64xf32> to vector<8x32xf32>
    %13 = vector.shape_cast %12 : vector<8x32xf32> to vector<1x8x32xf32>
    %c0_7 = arith.constant 0 : index
    %c0_8 = arith.constant 0 : index
    %c0_9 = arith.constant 0 : index
    %14 = vector.load %arg11[%c0_7, %c0_8, %c0_9] : memref<1x8x32xf32, #tpu.memory_space<vmem>>, vector<1x8x32xf32>
    "tpu.trace_start"() <{level = 10 : i32, message = "bqd,bkd->bqk"}> : () -> ()
    %cst_10 = arith.constant dense<0.000000e+00> : vector<1x8x8xf32>
    %15 = tpu.matmul %14, %11, %cst_10 {dimension_numbers = #tpu.dot_dimension_numbers<[2], [2], [1], [1], [0, 0, 0, 1, 1, 1], [0], [0]>} : vector<1x8x32xf32>, vector<1x8x32xf32>, vector<1x8x8xf32> -> vector<1x8x8xf32>
    "tpu.trace_stop"() : () -> ()
    %c0_11 = arith.constant 0 : index
    %c0_12 = arith.constant 0 : index
    %c0_13 = arith.constant 0 : index
    %16 = vector.load %arg12[%c0_11, %c0_12, %c0_13] : memref<1x8x1xf32, #tpu.memory_space<vmem>>, vector<1x8x1xf32>
    %cst_14 = arith.constant dense<0xFF800000> : vector<1x8xf32>
    %17 = vector.multi_reduction <maximumf>, %15, %cst_14 [2] : vector<1x8x8xf32> to vector<1x8xf32>
    %18 = vector.shape_cast %17 : vector<1x8xf32> to vector<1x8x1xf32>
    %19 = arith.maximumf %16, %18 : vector<1x8x1xf32>
    %c0_15 = arith.constant 0 : index
    %c0_16 = arith.constant 0 : index
    %c0_17 = arith.constant 0 : index
    %20 = vector.load %arg12[%c0_15, %c0_16, %c0_17] : memref<1x8x1xf32, #tpu.memory_space<vmem>>, vector<1x8x1xf32>
    %21 = arith.subf %20, %19 : vector<1x8x1xf32>
    %22 = math.exp %21 : vector<1x8x1xf32>
    %23 = vector.broadcast %19 : vector<1x8x1xf32> to vector<1x8x8xf32>
    %24 = arith.subf %15, %23 : vector<1x8x8xf32>
    %25 = math.exp %24 : vector<1x8x8xf32>
    %c0_18 = arith.constant 0 : index
    %c0_19 = arith.constant 0 : index
    %c0_20 = arith.constant 0 : index
    %26 = vector.load %arg13[%c0_18, %c0_19, %c0_20] : memref<1x8x1xf32, #tpu.memory_space<vmem>>, vector<1x8x1xf32>
    %27 = arith.mulf %22, %26 : vector<1x8x1xf32>
    %cst_21 = arith.constant dense<0.000000e+00> : vector<1x8xf32>
    %28 = vector.multi_reduction <add>, %25, %cst_21 [2] : vector<1x8x8xf32> to vector<1x8xf32>
    %29 = vector.shape_cast %28 : vector<1x8xf32> to vector<1x8x1xf32>
    %30 = arith.addf %27, %29 : vector<1x8x1xf32>
    %c0_22 = arith.constant 0 : index
    %c0_23 = arith.constant 0 : index
    %c0_24 = arith.constant 0 : index
    %31 = vector.load %arg13[%c0_22, %c0_23, %c0_24] : memref<1x8x1xf32, #tpu.memory_space<vmem>>, vector<1x8x1xf32>
    tpu.vector_store %arg13[%c0_22, %c0_23, %c0_24], %30 {strides = array<i32>} : memref<1x8x1xf32, #tpu.memory_space<vmem>>, vector<1x8x1xf32>,
    %c0_25 = arith.constant 0 : index
    %c0_26 = arith.constant 0 : index
    %c0_27 = arith.constant 0 : index
    %32 = vector.load %arg14[%c0_25, %c0_26, %c0_27] : memref<1x8x32xf32, #tpu.memory_space<vmem>>, vector<1x8x32xf32>
    %33 = vector.broadcast %22 : vector<1x8x1xf32> to vector<1x8x32xf32>
    %34 = arith.mulf %33, %32 : vector<1x8x32xf32>
    "tpu.trace_start"() <{level = 10 : i32, message = "bqk,bkd->bqd"}> : () -> ()
    %cst_28 = arith.constant dense<0.000000e+00> : vector<1x8x32xf32>
    %35 = tpu.matmul %25, %13, %cst_28 {dimension_numbers = #tpu.dot_dimension_numbers<[2], [1], [1], [2], [0, 0, 0, 1, 1, 2], [0], [0]>} : vector<1x8x8xf32>, vector<1x8x32xf32>, vector<1x8x32xf32> -> vector<1x8x32xf32>
    "tpu.trace_stop"() : () -> ()
    %36 = arith.addf %34, %35 : vector<1x8x32xf32>
    %c0_29 = arith.constant 0 : index
    %c0_30 = arith.constant 0 : index
    %c0_31 = arith.constant 0 : index
    %37 = vector.load %arg14[%c0_29, %c0_30, %c0_31] : memref<1x8x32xf32, #tpu.memory_space<vmem>>, vector<1x8x32xf32>
    tpu.vector_store %arg14[%c0_29, %c0_30, %c0_31], %36 {strides = array<i32>} : memref<1x8x32xf32, #tpu.memory_space<vmem>>, vector<1x8x32xf32>,
    %c0_32 = arith.constant 0 : index
    %c0_33 = arith.constant 0 : index
    %c0_34 = arith.constant 0 : index
    %38 = vector.load %arg12[%c0_32, %c0_33, %c0_34] : memref<1x8x1xf32, #tpu.memory_space<vmem>>, vector<1x8x1xf32>
    tpu.vector_store %arg12[%c0_32, %c0_33, %c0_34], %19 {strides = array<i32>} : memref<1x8x1xf32, #tpu.memory_space<vmem>>, vector<1x8x1xf32>,
    %c0_i32_35 = arith.constant 0 : i32
    %39 = arith.cmpi eq, %arg1, %c0_i32_35 : i32
    %40 = arith.extui %39 : i1 to i32
    %c0_i32_36 = arith.constant 0 : i32
    %41 = arith.cmpi ne, %40, %c0_i32_36 : i32
    scf.if %41 {
      %c0_37 = arith.constant 0 : index
      %c0_38 = arith.constant 0 : index
      %c0_39 = arith.constant 0 : index
      %42 = vector.load %arg14[%c0_37, %c0_38, %c0_39] : memref<1x8x32xf32, #tpu.memory_space<vmem>>, vector<1x8x32xf32>
      %c0_40 = arith.constant 0 : index
      %c0_41 = arith.constant 0 : index
      %c0_42 = arith.constant 0 : index
      %43 = vector.load %arg13[%c0_40, %c0_41, %c0_42] : memref<1x8x1xf32, #tpu.memory_space<vmem>>, vector<1x8x1xf32>
      %44 = vector.broadcast %43 : vector<1x8x1xf32> to vector<1x8x32xf32>
      %45 = arith.divf %42, %44 : vector<1x8x32xf32>
      %46 = vector.shape_cast %45 : vector<1x8x32xf32> to vector<8x32xf32>
      %c0_43 = arith.constant 0 : index
      %c0_44 = arith.constant 0 : index
      %47 = vector.load %arg8[%c0_43, %c0_44] : memref<32x32xf32, #tpu.memory_space<vmem>>, vector<32x32xf32>
      %cst_45 = arith.constant dense<0.000000e+00> : vector<8x32xf32>
      %48 = tpu.matmul %46, %47, %cst_45 {dimension_numbers = #tpu.dot_dimension_numbers<[1], [0], [0], [1], [0, 0, 1, 1], [], []>} : vector<8x32xf32>, vector<32x32xf32>, vector<8x32xf32> -> vector<8x32xf32>
      %c0_46 = arith.constant 0 : index
      %c0_47 = arith.constant 0 : index
      %49 = vector.load %arg9[%c0_46, %c0_47] : memref<1x32xf32, #tpu.memory_space<vmem>>, vector<1x32xf32>
      %50 = vector.broadcast %49 : vector<1x32xf32> to vector<8x32xf32>
      %51 = arith.addf %48, %50 : vector<8x32xf32>
      %52 = vector.shape_cast %51 : vector<8x32xf32> to vector<1x8x32xf32>
      %c0_48 = arith.constant 0 : index
      %c0_49 = arith.constant 0 : index
      %c0_50 = arith.constant 0 : index
      %53 = vector.load %arg10[%c0_48, %c0_49, %c0_50] : memref<1x8x32xf32, #tpu.memory_space<vmem>>, vector<1x8x32xf32>
      tpu.vector_store %arg10[%c0_48, %c0_49, %c0_50], %52 {strides = array<i32>} : memref<1x8x32xf32, #tpu.memory_space<vmem>>, vector<1x8x32xf32>,
    } else {
    }
    return
  }
  func.func @transform_0(%arg0: i32, %arg1: i32) -> (i32, i32, i32) {
    %c0_i32 = arith.constant 0 : i32
    %c0_i32_0 = arith.constant 0 : i32
    %c0_i32_1 = arith.constant 0 : i32
    return %arg0, %c0_i32, %c0_i32_0 : i32, i32, i32
  }
  func.func @transform_1(%arg0: i32, %arg1: i32) -> (i32, i32, i32) {
    %c0_i32 = arith.constant 0 : i32
    %c0_i32_0 = arith.constant 0 : i32
    return %arg0, %arg1, %c0_i32 : i32, i32, i32
  }
  func.func @transform_2(%arg0: i32, %arg1: i32) -> (i32, i32) {
    %c0_i32 = arith.constant 0 : i32
    %c0_i32_0 = arith.constant 0 : i32
    %c0_i32_1 = arith.constant 0 : i32
    return %c0_i32, %c0_i32_0 : i32, i32
  }
  func.func @transform_3(%arg0: i32, %arg1: i32) -> (i32, i32) {
    %c0_i32 = arith.constant 0 : i32
    %c0_i32_0 = arith.constant 0 : i32
    %c0_i32_1 = arith.constant 0 : i32
    return %c0_i32, %c0_i32_0 : i32, i32
  }
  func.func @transform_4(%arg0: i32, %arg1: i32) -> (i32, i32) {
    %c0_i32 = arith.constant 0 : i32
    %c0_i32_0 = arith.constant 0 : i32
    %c0_i32_1 = arith.constant 0 : i32
    return %c0_i32, %c0_i32_0 : i32, i32
  }
  func.func @transform_5(%arg0: i32, %arg1: i32) -> (i32, i32) {
    %c0_i32 = arith.constant 0 : i32
    %c0_i32_0 = arith.constant 0 : i32
    %c0_i32_1 = arith.constant 0 : i32
    return %c0_i32, %c0_i32_0 : i32, i32
  }
  func.func @transform_6(%arg0: i32, %arg1: i32) -> (i32, i32) {
    %c0_i32 = arith.constant 0 : i32
    %c0_i32_0 = arith.constant 0 : i32
    %c0_i32_1 = arith.constant 0 : i32
    return %c0_i32, %c0_i32_0 : i32, i32
  }
  func.func @transform_7(%arg0: i32, %arg1: i32) -> (i32, i32) {
    %c0_i32 = arith.constant 0 : i32
    %c0_i32_0 = arith.constant 0 : i32
    %c0_i32_1 = arith.constant 0 : i32
    return %c0_i32, %c0_i32_0 : i32, i32
  }
  func.func @transform_8(%arg0: i32, %arg1: i32) -> (i32, i32, i32) {
    %c0_i32 = arith.constant 0 : i32
    %c0_i32_0 = arith.constant 0 : i32
    %c0_i32_1 = arith.constant 0 : i32
    return %arg0, %c0_i32, %c0_i32_0 : i32, i32, i32
  }
}

</mosaic_0001>

<bundles_post_ra>
// kernel: tpu_custom_call.1
= control target key start
LH: loop header
LB: loop body
LE: loop exit
PB: predicated region body
PF: predicated region fallthrough
CT: control target
= control target key end

     0   :  { %s1911_s0 = inlined_call_operand.hbm [shape: f32[2,8,32], index: 0, kind: input, shape index: {}]   ;;  %s1912_s1 = inlined_call_operand.hbm [shape: f32[2,8,32], index: 1, kind: input, shape index: {}]   ;;  %s1913_s2 = inlined_call_operand.hbm [shape: f32[32,32], index: 2, kind: input, shape index: {}]   ;;  %s1914_s3 = inlined_call_operand.vmem [shape: f32[1,32], index: 3, kind: input, shape index: {}]   ;;  %s1915_s4 = inlined_call_operand.hbm [shape: f32[32,64], index: 4, kind: input, shape index: {}]   ;;  %s1916_s5 = inlined_call_operand.vmem [shape: f32[1,64], index: 5, kind: input, shape index: {}]   ;;  %s1917_s6 = inlined_call_operand.hbm [shape: f32[32,32], index: 6, kind: input, shape index: {}]   ;;  %s1918_s7 = inlined_call_operand.vmem [shape: f32[1,32], index: 7, kind: input, shape index: {}]   ;;  %s1919_s8 = inlined_call_operand.hbm [shape: f32[2,8,32], index: 8, kind: output, shape index: {}]  }
   0x1   :  { %1927 = sst [smem:[#allocation23_spill]] %s1913_s2 }
   0x2   :  { %1928 = sst [smem:[#allocation24_spill]] %s1915_s4 }
   0x3   :  { %1929 = sst [smem:[#allocation25_spill]] %s1917_s6 }
   0x4   :  { %1930 = sst [smem:[#allocation26_spill]] %s1918_s7 }
   0x5   :  { %1931 = sst [smem:[#allocation27_spill]] %s1919_s8 }
   0x6   :  { %13 = vsyncpa [#allocation7], 0 }
   0x7   :  { %15 = vsyncpa [#allocation7 + $0x1], 0 }
   0x8   :  { %16 = vsyncpa [#allocation10], 0 }
   0x9   :  { %18 = vsyncpa [#allocation10 + $0x1], 0 }
   0xa   :  { %19 = vsyncpa [#allocation13], 0 }
   0xb   :  { %20 = vsyncpa [#allocation8], 0 }
   0xc   :  { %22 = vsyncpa [#allocation8 + $0x1], 0  ;;  %s1550_s27 = smov 0   ;;  %s1552_s28 = smov 0  }
   0xd   :  { %s1554_s29 = smov 0   ;;  %s1556_s30 = smov 0  }
   0xe   :  { %s1558_s9 = smov 0   ;;  %s1560_s10 = smov 0  }
   0xf LB: > { %1932 = sst [smem:[#allocation21_spill]] %s1469_s27  ;;  %s1581_s11 = sadd.s32 4294967295, %s1489_s10   ;;  %s1489_s10 = sphi %s1560_s10, %s28_s10   ;;  %s1485_s9 = sphi %s1558_s9, %s1962_s9   ;;  %s1481_s30 = sphi %s1556_s30, %s1961_s30   ;;  %s1477_s29 = sphi %s1554_s29, %s1960_s29   ;;  %s1473_s28 = sphi %s1552_s28, %s1959_s28   ;;  %s1469_s27 = sphi %s1550_s27, %s1958_s27  }
  0x10   : > { %s1027_s12 = sadd.s32 4294967294, %s1489_s10   ;;  %p60_p0 = scmp.ne.s32.totalorder %s1473_s28, %s1469_s27 }
  0x11   : > { %p1920_p1 = scmp.eq.s32.totalorder %s1581_s11, 0  ;;  %p244_p3 = scmp.eq.s32.totalorder %s1027_s12, 1 }
  0x12   : > { %p1028_p5 = scmp.ge.s32.totalorder %s1489_s10, 1  ;;  %p251_p7 = scmp.lt.s32.totalorder %s1489_s10, 3 }
  0x13   : > { %p1590_p4 = por %p1920_p1, %p60_p0  ;;  %p1595_p6 = por %p244_p3, %p60_p0 }
  0x14   : > { %p1600_p8 = pnand %p1028_p5, %p251_p7  ;;  %s1491_s16 = smov [#allocation11]  }
  0x15   : > { %s1933_s13 = scalar_select %p1590_p4, 1, 0 }
  0x16   : > { %s1934_s14 = scalar_select %p1595_p6, 1, 0 }
  0x17   : > { %s1936_s15 = scalar_select %p1600_p8, 1, 0 }
  0x18   : > { %1935 = sst [smem:[#allocation22_spill]] %s1934_s14  ;;  %s263_s17 = sshll.u32 %s1491_s16, 4  ;;  %s1604_s17 = int_to_ptr.vmem [resolvable:$true] %s263_s17 }
  0x19   : > { %p1155_p9 = pneg %p1600_p8  ;;  %s1492_s19 = smov [#allocation12]  }
  0x1a   : > { %s279_s20 = sshll.u32 %s1492_s19, 4  ;;  %s1493_s21 = smov [#allocation14]   ;;  %s1615_s20 = int_to_ptr.vmem [resolvable:$true] %s279_s20 }
  0x1b   : > { %p1611_p11 = pnand %p1155_p9, %p1920_p1  ;;  %s1617_s22 = sshll.u32 %s1493_s21, 4  ;;  %s296_s22 = int_to_ptr.vmem [resolvable:$true] %s1617_s22 }
  0x1c   : > { %s1938_s2 = sld [smem:[#allocation23_spill]] }
  0x1d   : > { %p1627_p13 = pneg %p1611_p11 }
  0x22   : > { %s1251_s25 = scalar_lea.hbm %s1938_s2, 512 }
  0x23   : > { %p1252_p12 = scmp.ne.s32.totalorder %s1938_s2, %s1251_s25  ;;  %p1258_p5 = scmp.lt.u32.totalorder %s1251_s25, %s1938_s2 }
  0x25   : > { %p1254_p0 = pnand %p1627_p13, %p1252_p12 }
  0x27   : > { %p1255_p3 = pneg %p1254_p0 }
  0x29   : > { %p1260_p7 = pnand %p1258_p5, %p1255_p3 }
  0x2b   : > { %1263 = shalt.err (!%p1260_p7)
}
  0x2c   : > { %s1264_s23 = scalar_lea.vmem %s1604_s17, 512  ;;  %p1272_p2 = scmp.lt.s32.totalorder %s1604_s17, %s1604_s17 }
  0x2d   : > { %p1265_p9 = scmp.ne.s32.totalorder %s1604_s17, %s1264_s23  ;;  %p1273_p6 = scmp.lt.s32.totalorder %s1264_s23, %s1264_s23 }
  0x2f   : > { %p1267_p10 = pnand %p1265_p9, %p1627_p13  ;;  %p1274_p12 = por %p1273_p6, %p1272_p2 }
  0x31   : > { %p1268_p1 = pneg %p1267_p10 }
  0x33   : > { %p1275_p0 = pnand %p1274_p12, %p1268_p1 }
  0x35   : > { %1278 = shalt.err (!%p1275_p0)
}
  0x36   : > { %s1494_s24 = smov 128   ;;  %s1495_s25 = smov 8  }
  0x37   : > { %1158 = dma.hbm_to_vmem [thread:$0]  (!%p1611_p11), %s1938_s2, 512, %s1604_s17, [#allocation10], %s1494_s24, %s1494_s24, %s1495_s25  }
  0x38   : > { %s1940_s4 = sld [smem:[#allocation24_spill]] }
  0x3e   : > { %s1279_s23 = scalar_lea.hbm %s1940_s4, 512 }
  0x3f   : > { %p1280_p1 = scmp.ne.s32.totalorder %s1940_s4, %s1279_s23  ;;  %p1286_p10 = scmp.lt.u32.totalorder %s1279_s23, %s1940_s4 }
  0x41   : > { %p1282_p2 = pnand %p1280_p1, %p1627_p13 }
  0x43   : > { %p1283_p6 = pneg %p1282_p2 }
  0x45   : > { %p1288_p3 = pnand %p1286_p10, %p1283_p6 }
  0x47   : > { %1291 = shalt.err (!%p1288_p3)
}
  0x48   : > { %s1292_s17 = scalar_lea.vmem %s1615_s20, 512  ;;  %p1300_p12 = scmp.lt.s32.totalorder %s1615_s20, %s1615_s20 }
  0x49   : > { %p1293_p5 = scmp.ne.s32.totalorder %s1615_s20, %s1292_s17  ;;  %p1301_p0 = scmp.lt.s32.totalorder %s1292_s17, %s1292_s17 }
  0x4b   : > { %p1295_p7 = pnand %p1293_p5, %p1627_p13  ;;  %p1302_p1 = por %p1301_p0, %p1300_p12 }
  0x4d   : > { %p1296_p9 = pneg %p1295_p7 }
  0x4f   : > { %p1303_p2 = pnand %p1302_p1, %p1296_p9 }
  0x51   : > { %1306 = shalt.err (!%p1303_p2)
}
  0x52   : > { %1161 = dma.hbm_to_vmem [thread:$0]  (!%p1611_p11), %s1940_s4, 512, %s1615_s20, [#allocation13], %s1494_s24, %s1494_s24, %s1495_s25  }
  0x53   : > { %s1941_s6 = sld [smem:[#allocation25_spill]] }
  0x59   : > { %s1307_s26 = scalar_lea.hbm %s1941_s6, 512 }
  0x5a   : > { %p1308_p6 = scmp.ne.s32.totalorder %s1941_s6, %s1307_s26  ;;  %p1314_p5 = scmp.lt.u32.totalorder %s1307_s26, %s1941_s6 }
  0x5c   : > { %p1310_p10 = pnand %p1308_p6, %p1627_p13 }
  0x5e   : > { %p1311_p3 = pneg %p1310_p10 }
  0x60   : > { %p1316_p7 = pnand %p1314_p5, %p1311_p3 }
  0x62   : > { %1319 = shalt.err (!%p1316_p7)
}
  0x63   : > { %s1320_s17 = scalar_lea.vmem %s296_s22, 512  ;;  %p1328_p1 = scmp.lt.s32.totalorder %s296_s22, %s296_s22 }
  0x64   : > { %p1321_p9 = scmp.ne.s32.totalorder %s296_s22, %s1320_s17  ;;  %p1329_p2 = scmp.lt.s32.totalorder %s1320_s17, %s1320_s17 }
  0x66   : > { %p1323_p12 = pnand %p1321_p9, %p1627_p13  ;;  %p1330_p4 = por %p1329_p2, %p1328_p1 }
  0x68   : > { %p1324_p0 = pneg %p1323_p12 }
  0x6a   : > { %p1331_p8 = pnand %p1330_p4, %p1324_p0 }
  0x6c   : > { %1334 = shalt.err (!%p1331_p8)
}
  0x6d   : > { %1164 = dma.hbm_to_vmem [thread:$0]  (!%p1611_p11), %s1941_s6, 512, %s296_s22, [#allocation13], %s1494_s24, %s1494_s24, %s1495_s25  }
  0x6e   : > { %s47_s16 = sadd.s32 1, %s1477_s29  ;;  %s40_s18 = sadd.s32 1, %s1485_s9 }
  0x6f   : > { %p54_p4 = scmp.ne.s32.totalorder %s1477_s29, %s1473_s28  ;;  %p42_p8 = scmp.ge.s32.totalorder %s40_s18, 2 }
  0x70   : > { %p55_p13 = scmp.eq.s32.totalorder %s1489_s10, 0  ;;  %p1942_p6 = scmp.eq.s32.totalorder %s1581_s11, 1 }
  0x71   : > { %p1179_p3 = scmp.lt.s32.totalorder %s1489_s10, 2  ;;  %s1964_s18 = smov (%p42_p8, %s40_s18), 0 }
  0x72   : > { %p1706_p10 = por %p1942_p6, %p54_p4  ;;  %p56_p5 = por %p55_p13, %p54_p4 }
  0x73   : > { %s312_s27 = sand.u32 1, %s1477_s29   ;;  %s44_s14 = ssub.s32 %s1485_s9, %s1964_s18 }
  0x74   : > { %s1943_s8 = scalar_select %p1706_p10, 1, 0 }
  0x75   : > { %p45_p11 = scmp.eq.s32.totalorder %s44_s14, 0  ;;  %s1716_s22 = sshll.u32 %s312_s27, 3 }
  0x76   : > { %s1034_s24 = sshll.u32 %s1485_s9, 7  ;;  %s316_s21 = scalar_lea.vmem [#allocation6], %s1716_s22 }
  0x77   : > { %s1720_s25 = scalar_select %p45_p11, %s1477_s29, %s47_s16  }
  0x78   : > { %s1725_s19 = scalar_lea.hbm %s1911_s0, %s1034_s24  ;;  %s323_s23 = sshll.u32 %s316_s21, 4  ;;  %s1728_s23 = int_to_ptr.vmem [resolvable:$true] %s323_s23 }
  0x79   : > { %p1732_p7 = pnand %p1179_p3, %p56_p5  ;;  %s1739_s16 = scalar_lea.hbm %s1912_s1, %s1034_s24 }
  0x7a   : > { %s330_s14 = sand.u32 1, %s1489_s10   ;;  %s313_s26 = scalar_lea.sflag [#allocation7], %s312_s27 }
  0x7b   : > { %s1335_s12 = scalar_lea.hbm %s1725_s19, 128  ;;  %p1337_p12 = pneg %p1732_p7 }
  0x7c   : > { %p1336_p9 = scmp.ne.s32.totalorder %s1725_s19, %s1335_s12  ;;  %s1340_s4 = scalar_lea.hbm %s1911_s0, 256 }
  0x7d   : > { %p1341_p2 = scmp.lt.u32.totalorder %s1725_s19, %s1911_s0  ;;  %p1342_p4 = scmp.lt.u32.totalorder %s1340_s4, %s1335_s12 }
  0x7e   : > { %p1338_p0 = pnand %p1337_p12, %p1336_p9  ;;  %p1344_p13 = scmp.lt.u32.totalorder %s1335_s12, %s1725_s19 }
  0x7f   : > { %p1343_p8 = por %p1342_p4, %p1341_p2 }
  0x80   : > { %p1339_p1 = pneg %p1338_p0 }
  0x81   : > { %p1345_p6 = por %p1344_p13, %p1343_p8 }
  0x83   : > { %p1346_p3 = pnand %p1345_p6, %p1339_p1 }
  0x85   : > { %1349 = shalt.err (!%p1346_p3)
}
  0x86   : > { %s1350_s27 = scalar_lea.vmem %s1728_s23, 128  ;;  %s1496_s2 = smov [#allocation6]  }
  0x87   : > { %p1351_p5 = scmp.ne.s32.totalorder %s1728_s23, %s1350_s27  ;;  %s1355_s24 = sshll.u32 %s1496_s2, 4  ;;  %s1356_s24 = int_to_ptr.vmem [resolvable:$false] %s1355_s24 }
  0x88   : > { %s1357_s6 = scalar_lea.vmem %s1356_s24, 256  ;;  %p1358_p0 = scmp.lt.s32.totalorder %s1728_s23, %s1356_s24 }
  0x89   : > { %p1353_p11 = pnand %p1351_p5, %p1337_p12  ;;  %p1359_p2 = scmp.lt.s32.totalorder %s1357_s6, %s1350_s27 }
  0x8b   : > { %p1354_p9 = pneg %p1353_p11  ;;  %p1360_p4 = por %p1359_p2, %p1358_p0 }
  0x8d   : > { %p1361_p8 = pnand %p1360_p4, %p1354_p9 }
  0x8f   : > { %1364 = shalt.err (!%p1361_p8)
}
  0x90   : > { %1168 = dma.hbm_to_vmem [thread:$0]  (!%p1732_p7), %s1725_s19, 128, %s1728_s23, %s313_s26  }
  0x91   : > { %s334_s4 = scalar_lea.vmem [#allocation9], %s1716_s22  ;;  %s331_s12 = scalar_lea.sflag [#allocation10], %s330_s14 }
  0x92   : > { %s342_s7 = sshll.u32 %s334_s4, 4  ;;  %s1365_s21 = scalar_lea.hbm %s1739_s16, 128  ;;  %s343_s7 = int_to_ptr.vmem [resolvable:$true] %s342_s7 }
  0x93   : > { %p1366_p1 = scmp.ne.s32.totalorder %s1739_s16, %s1365_s21  ;;  %s1370_s2 = scalar_lea.hbm %s1912_s1, 256 }
  0x94   : > { %p1371_p3 = scmp.lt.u32.totalorder %s1739_s16, %s1912_s1  ;;  %p1372_p5 = scmp.lt.u32.totalorder %s1370_s2, %s1365_s21 }
  0x95   : > { %p1368_p13 = pnand %p1366_p1, %p1337_p12  ;;  %p1374_p9 = scmp.lt.u32.totalorder %s1365_s21, %s1739_s16 }
  0x96   : > { %p1373_p11 = por %p1372_p5, %p1371_p3 }
  0x97   : > { %p1369_p6 = pneg %p1368_p13 }
  0x98   : > { %p1375_p0 = por %p1374_p9, %p1373_p11 }
  0x9a   : > { %p1376_p2 = pnand %p1375_p0, %p1369_p6 }
  0x9c   : > { %1379 = shalt.err (!%p1376_p2)
}
  0x9d   : > { %s1380_s22 = scalar_lea.vmem %s343_s7, 128  ;;  %s1497_s19 = smov [#allocation9]  }
  0x9e   : > { %p1381_p4 = scmp.ne.s32.totalorder %s343_s7, %s1380_s22  ;;  %s1385_s23 = sshll.u32 %s1497_s19, 4  ;;  %s1386_s23 = int_to_ptr.vmem [resolvable:$false] %s1385_s23 }
  0x9f   : > { %s1387_s14 = scalar_lea.vmem %s1386_s23, 256  ;;  %p1388_p13 = scmp.lt.s32.totalorder %s343_s7, %s1386_s23 }
  0xa0   : > { %p1383_p8 = pnand %p1381_p4, %p1337_p12  ;;  %p1389_p10 = scmp.lt.s32.totalorder %s1387_s14, %s1380_s22 }
  0xa2   : > { %p1384_p1 = pneg %p1383_p8  ;;  %p1390_p3 = por %p1389_p10, %p1388_p13 }
  0xa4   : > { %p1391_p5 = pnand %p1390_p3, %p1384_p1 }
  0xa6   : > { %1394 = shalt.err (!%p1391_p5)
}
  0xa7   : > { %1171 = dma.hbm_to_vmem [thread:$0]  (!%p1732_p7), %s1739_s16, 128, %s343_s7, %s331_s12  }
  0xa8   : > { %p1945_p6 = scmp.ne.s32.totalorder %s1936_s15, 0 }
  0xa9   : > { %s1792_s26 = sand.u32 (!%p1945_p6), 1, %s1473_s28   ;;  %p1946_p10 = scmp.ne.s32.totalorder (!%p1945_p6), %s1933_s13, 0 }
  0xaa   : > { %351 = sbr.rel (%p1945_p6) target bundleno = 1441 (0x5a1), region = 52  ;;  %s1795_s4 = sshll.u32 (!%p1945_p6), %s1792_s26, 3 }
  0xab   : > { %s354_s21 = scalar_lea.sflag (!%p1945_p6), [#allocation7], %s1792_s26  ;;  %s357_s20 = scalar_lea.vmem (!%p1945_p6), [#allocation6], %s1795_s4 }
  0xb1   : > { %1448 = dma.done.wait (%p1946_p10), %s354_s21, 128  }
  0xb2   : > { %1450 = vsyncadd (%p1946_p10), %s354_s21, 4294967168  ;;  %s362_s15 = sand.u32 1, %s1581_s11   ;;  %s366_s16 = scalar_lea.vmem [#allocation9], %s1795_s4 }
  0xb3   : > { %s363_s17 = scalar_lea.sflag [#allocation10], %s362_s15 }
  0xb4   : > { %1452 = dma.done.wait (%p1946_p10), %s363_s17, 128  }
  0xb5   : > { %1454 = vsyncadd (%p1946_p10), %s363_s17, 4294967168  ;;  %p1947_p7 = scmp.eq.s32.totalorder %s1581_s11, 0 }
  0xb7   : > { %1456 = dma.done.wait (%p1947_p7), [#allocation10], 512   ;;  %p1948_p12 = pmov %p1947_p7 }
  0xb8   : > { %p1949_p11 = pmov %p1947_p7 }
  0xb9   : > { %1458 = vsyncadd (%p1948_p12), [#allocation10], 4294966784 }
  0xba   : > { %1460 = dma.done.wait (%p1949_p11), [#allocation13], 1024   ;;  %p1950_p9 = pmov %p1947_p7 }
  0xbb   : > { %vm432_vm0 = vcmask 261120   ;;  %v1498_v0 = vmov 0.0|0.0   ;;  %v1499_v1 = vmov 0.0   ;;  %vm1500_vm1 = vmmov 0   ;;  %v421_v2 = vld [vmem:[#allocation11] sm:$0xff]  ;;  %v422_v3 = vld [vmem:[#allocation11 + $0x8] sm:$0xff] }
  0xbc   : > { %1462 = vsyncadd (%p1950_p9), [#allocation13], 4294966272  ;;  %1119 = vmatprep.subr.bf16.mxu0 %v1498_v0  ;;  %1125 = vmatprep.subr.bf16.mxu1 %v1498_v0  ;;  %510 = vst.msk [vmem:[#allocation5] sm:$0xff] %vm432_vm0, %v1499_v1  ;;  %v512_v4 = vld [vmem:[#allocation12] sm:$0xff]  ;;  %v1120_v5 = vpack.c.bf16 %v422_v3, %v421_v2  ;;  %v513_v6 = vld [vmem:[#allocation12 + $0x8] sm:$0xff]  ;;  %s1501_s27 = smov 96  }
  0xbd   : > { %1084 = vmatprep.mubr.msk.f32.mxu0 %vm1500_vm1, %v1499_v1  ;;  %1095 = vmatprep.mubr.msk.f32.mxu1 %vm1500_vm1, %v1499_v1  ;;  %v423_v7 = vld [vmem:[#allocation11 + $0x10] sm:$0xff]  ;;  %v424_v8 = vld [vmem:[#allocation11 + $0x18] sm:$0xff]  ;;  %v1126_v9 = vpack.c.bf16 %v513_v6, %v512_v4  ;;  %v420_v14 = vld [vmem:[%s357_s20] sm:$0xff]  ;;  %vm507_vm2 = vcmask 7168   ;;  %v1502_v25 = vmov -inf   ;;  %vm675_vm3 = vcmask 64512  }
  0xbe   : > { %v514_v10 = vld [vmem:[#allocation12 + $0x10] sm:$0xff]  ;;  %v515_v11 = vld [vmem:[#allocation12 + $0x18] sm:$0xff]  ;;  %1121 = vmatpush3.bf16.msra.mxu0 %v1120_v5  ;;  %v1123_v12 = vpack.c.bf16 %v424_v8, %v423_v7  ;;  %v1044_v16 = vld [vmem:[%s1914_s3] ss:$0 sm:$0xff]  ;;  %508 = vst.msk [vmem:[#allocation3] sm:$0xff] %vm507_vm2, %v1502_v25  ;;  %v1503_v30 = vmov 0  }
  0xbf   : > { %1122 = vmatprep.subr.bf16.mxu0 %v1498_v0  ;;  %1127 = vmatpush3.bf16.msra.mxu1 %v1126_v9  ;;  %v1129_v13 = vpack.c.bf16 %v515_v11, %v514_v10  ;;  %v511_v15 = vld [vmem:[%s366_s16] sm:$0xff]  ;;  %v1046_v17 = vld [vmem:[%s1916_s5] ss:$0 sm:$0xff]  ;;  %509 = vst.msk [vmem:[#allocation4] sm:$0xff] %vm507_vm2, %v1499_v1  ;;  %v798_v48 = vld [vmem:[#allocation14 + $0x8] sm:$0xff]  ;;  %s1951_s6 = sld [smem:[#allocation26_spill]] }
  0xc0   : > { %1128 = vmatprep.subr.bf16.mxu1 %v1498_v0  ;;  %1243 = vset.pattern.permute.xlu0 %v1503_v30  ;;  %v797_v47 = vld [vmem:[#allocation14] sm:$0xff]  ;;  %v799_v50 = vld [vmem:[#allocation14 + $0x10] sm:$0xff]  ;;  %v800_v51 = vld [vmem:[#allocation14 + $0x18] sm:$0xff]  ;;  %s1054_s22 = sshll.u32 %s1481_s30, 7  ;;  %s415_s19 = scalar_lea.vmem [#allocation15], %s1795_s4 }
  0xc1   : > { %1244 = vset.pattern.permute.xlu1 %v1503_v30  ;;  %v1132_v49 = vpack.c.bf16 %v798_v48, %v797_v47  ;;  %v1135_v52 = vpack.c.bf16 %v800_v51, %v799_v50  ;;  %s896_s23 = sshll.u32 %s415_s19, 4  ;;  %s1952_s20 = sld [smem:[#allocation27_spill]]  ;;  %s1863_s23 = int_to_ptr.vmem [resolvable:$true] %s896_s23 }
  0xc2   : > { %1124 = vmatpush3.bf16.msra.mxu0 %v1123_v12  ;;  %s883_s17 = scalar_lea.sflag [#allocation8], %s1792_s26  ;;  %s1395_s16 = scalar_lea.vmem %s1863_s23, 128 }
  0xc3   : > { %1130 = vmatpush3.bf16.msra.mxu1 %v1129_v13  ;;  %1131 = vmatprep.subr.bf16.mxu0 %v1498_v0  ;;  %v699_v53 = vld [vmem:[#allocation5] sm:$0xff]  ;;  %p1396_p0 = scmp.ne.s32.totalorder %s1863_s23, %s1395_s16  ;;  %p1953_p2 = scmp.ne.s32.totalorder %s1943_s8, 0 }
  0xc4   : > { %1098 = vmatprep.subr.mxu1 %v1499_v1  ;;  %s1504_s30 = smov [#allocation15]  }
  0xc5   : > { %1085 = vmatmul.mubr.msk.f32.vlgmr.msra.gmra.mrb[0].mxu0 %vm432_vm0, %v420_v14  ;;  %v674_v31 = vld [vmem:[#allocation3] sm:$0xff]  ;;  %v1051_v63 = vld [vmem:[%s1951_s6] ss:$0 sm:$0xff]  ;;  %p1397_p4 = pnand %p1396_p0, %p1953_p2  ;;  %s1399_s4 = sshll.u32 %s1504_s30, 4  ;;  %s1400_s4 = int_to_ptr.vmem [resolvable:$false] %s1399_s4 }
  0xc6   : > { %1096 = vmatmul.mubr.msk.f32.vlgmr.msra.gmra.mrb[0].mxu1 %vm432_vm0, %v511_v15  ;;  %1116 = vmatprep.mubr.msk.f32.mxu0 %vm1500_vm1, %v1499_v1  ;;  %v691_v42 = vld [vmem:[#allocation4] sm:$0xff]  ;;  %s1401_s11 = scalar_lea.vmem %s1400_s4, 256  ;;  %p1402_p1 = scmp.lt.s32.totalorder %s1863_s23, %s1400_s4 }
  0xc7   : > { %1100 = vmatprep.mubr.msk.f32.mxu1 %vm1500_vm1, %v1499_v1  ;;  %1133 = vmatpush3.bf16.msra.mxu0 %v1132_v49  ;;  %s1861_s15 = scalar_lea.hbm %s1952_s20, %s1054_s22  ;;  %p1398_p8 = pneg %p1397_p4 }
  0xc8   : > { %1134 = vmatprep.subr.bf16.mxu0 %v1498_v0  ;;  %p1403_p13 = scmp.lt.s32.totalorder %s1401_s11, %s1395_s16 }
  0xca   : > { %p1404_p3 = por %p1403_p13, %p1402_p1 }
  0xcb   : > { %1136 = vmatpush3.bf16.msra.mxu0 %v1135_v52 }
  0xcc   : > { %p1405_p5 = pnand %p1404_p3, %p1398_p8 }
 0x198   : > { %v502_v18 = vpop.f32.mrb[0].mxu0 }
 0x199   : > { %v503_v19 = vadd.f32 %v1044_v16, %v502_v18  ;;  %v1086_v20 = vpop.f32.mrb[1].mxu0  ;;  %v593_v21 = vpop.f32.mrb[0].mxu1 }
 0x19a   : > { %v594_v22 = vadd.f32 %v1046_v17, %v593_v21  ;;  %v1097_v23 = vpop.f32.mrb[1].mxu1 }
 0x19b   : > { %506 = vst.msk [vmem:[#allocation2] sm:$0xff] %vm432_vm0, %v503_v19 }
 0x19c   : > { %706 = vrot.lane.b32.xlu1 %v594_v22, %s1501_s27  ;;  %1099 = vmatpush3.xpose.msk.msra.mxu1 %vm432_vm0, %v594_v22 }
 0x19d   : > { %1103 = vmatprep.subr.mxu1 %v1499_v1 }
 0x1a2   : > { %v597_v24 = vld [vmem:[#allocation2] sm:$0xff] }
 0x1a3   : > { %1101 = vmatmul.mubr.msk.f32.vlgmr.msra.gmra.mrb[2].mxu1 %vm432_vm0, %v597_v24 }
 0x1a4   : > { %1105 = vmatprep.mubr.msk.f32.mxu1 %vm1500_vm1, %v1499_v1 }
 0x20e   : > { %v707_v26 = vpop.permute.xlu1 %706 }
 0x20f   : > { %1104 = vmatpush3.msra.mxu1 %v707_v26 }
 0x276   : > { %v670_v27 = vpop.f32.mrb[2].mxu1 }
 0x277   : > { %v1102_v28 = vpop.f32.mrb[3].mxu1  ;;  %v676_v29 = vsel %vm675_vm3, %v670_v27, -inf }
 0x278   : > { %677 = vmax.xlane.f32.xlu0 %v676_v29 }
 0x305   : > { %v678_v32 = vpop.xlane.xlu0 %677 }
 0x306   : > { %v679_v33 = vmax.f32 %v674_v31, %v678_v32 }
 0x308   : > { %v680_v34 = vsub.f32 %v674_v31, %v679_v33  ;;  %784 = vst.msk [vmem:[#allocation3] sm:$0xff] %vm507_vm2, %v679_v33  ;;  %685 = vperm.xlu0 %1243, %v679_v33  }
 0x30a   : > { %v681_v40 = vmul.f32 1.442695, %v680_v34 }
 0x387   : > { %v686_v35 = vpop.permute.xlu0 %685 }
 0x388   : > { %v688_v36 = vsub.f32 %v670_v27, %v686_v35 }
 0x38a   : > { %v689_v37 = vmul.f32 1.442695, %v688_v36 }
 0x38c   : > { %1245 = vpow2.f32 %v689_v37 }
 0x38d   : > { %1247 = vpow2.f32 %v681_v40 }
 0x396   : > { %v1246_v38 = vpop.eup %1245 }
 0x397   : > { %1106 = vmatmul.mubr.msk.f32.vlgmr.msra.gmra.mrb[4].mxu1 %vm675_vm3, %v1246_v38  ;;  %v693_v39 = vsel %vm675_vm3, %v1246_v38, 0.0  ;;  %v1248_v41 = vpop.eup %1247 }
 0x398   : > { %694 = vadd.xlane.f32.xlu1 %v693_v39  ;;  %v692_v43 = vmul.f32 %v1248_v41, %v691_v42 }
 0x3a9   : > { %702 = vperm.xlu1 %1244, %v1248_v41  }
 0x425   : > { %v695_v44 = vpop.xlane.xlu1 %694 }
 0x426   : > { %v696_v45 = vadd.f32 %v695_v44, %v692_v43 }
 0x428   : > { %698 = vst.msk [vmem:[#allocation4] sm:$0xff] %vm507_vm2, %v696_v45 }
 0x429   : > { %v703_v54 = vpop.permute.xlu1 %702 }
 0x42a   : > { %v705_v55 = vmul.f32 %v703_v54, %v699_v53 }
 0x42f   : > { %v789_v46 = vld [vmem:[#allocation4] sm:$0xff] }
 0x430   : > { %792 = vperm.xlu0 %1243, %v789_v46  }
 0x46a   : > { %v778_v56 = vpop.f32.mrb[4].mxu1 }
 0x46b   : > { %v782_v57 = vadd.f32 %v778_v56, %v705_v55  ;;  %v1107_v58 = vpop.f32.mrb[5].mxu1 }
 0x46d   : > { %783 = vst.msk [vmem:[#allocation5] sm:$0xff] %vm432_vm0, %v782_v57 }
 0x474   : > { %v788_v61 = vld [vmem:[#allocation5] sm:$0xff] }
 0x4af   : > { %v793_v59 = vpop.permute.xlu0 %792 }
 0x4b0   : > { %1249 = vrcp.f32 %v793_v59 }
 0x4ba   : > { %v1250_v60 = vpop.eup %1249 }
 0x4bb   : > { %v796_v62 = vmul.f32 %v1250_v60, %v788_v61 }
 0x4bd   : > { %1117 = vmatmul.mubr.msk.f32.vlgmr.msra.gmra.mrb[2].mxu0 %vm432_vm0, %v796_v62 }
 0x590   : > { %v877_v0 = vpop.f32.mrb[2].mxu0 }
 0x591   : > { %v878_v1 = vadd.f32 %v1051_v63, %v877_v0  ;;  %v1118_v2 = vpop.f32.mrb[3].mxu0 }
 0x593   : > { %881 = vst.msk [vmem:[%s415_s19] sm:$0xff] %vm432_vm0, %v878_v1 }
 0x594   : > { %1408 = shalt.err (!%p1405_p5)
}
 0x595   : > { %s1409_s26 = scalar_lea.hbm %s1861_s15, 128  ;;  %s1413_s12 = scalar_lea.hbm %s1952_s20, 256 }
 0x596   : > { %p1410_p6 = scmp.ne.s32.totalorder %s1861_s15, %s1409_s26  ;;  %p1414_p12 = scmp.lt.u32.totalorder %s1861_s15, %s1952_s20 }
 0x597   : > { %p1415_p11 = scmp.lt.u32.totalorder %s1413_s12, %s1409_s26  ;;  %p1417_p0 = scmp.lt.u32.totalorder %s1409_s26, %s1861_s15 }
 0x598   : > { %p1411_p10 = pnand %p1410_p6, %p1953_p2 }
 0x599   : > { %p1416_p9 = por %p1415_p11, %p1414_p12 }
 0x59a   : > { %p1412_p7 = pneg %p1411_p10 }
 0x59b   : > { %p1418_p4 = por %p1417_p0, %p1416_p9 }
 0x59d   : > { %p1419_p8 = pnand %p1418_p4, %p1412_p7 }
 0x59f   : > { %1422 = shalt.err (!%p1419_p8)
}
 0x5a0   : > { %1153 = dma.vmem_to_hbm [thread:$0]  (%p1953_p2), %s1863_s23, 128, %s1861_s15, %s883_s17  }
 0x5a1 PF: > { %s1954_s24 = sld [smem:[#allocation21_spill]]  ;;  %s1955_s6 = sld [smem:[#allocation22_spill]] }
 0x5a2   : > { %p1957_p13 = scmp.ge.s32.totalorder %s1489_s10, 2 }
 0x5a7   : > { %s908_s22 = sand.u32 1, %s1954_s24   ;;  %p1956_p1 = scmp.ne.s32.totalorder %s1955_s6, 0 }
 0x5a8   : > { %s909_s19 = scalar_lea.sflag [#allocation8], %s908_s22 }
 0x5a9   : > { %p1173_p3 = pnand %p1957_p13, %p1956_p1 }
 0x5ab   : > { %1464 = dma.done.wait (!%p1173_p3), %s909_s19, 128  }
 0x5ac   : > { %1466 = vsyncadd (!%p1173_p3), %s909_s19, 4294967168  ;;  %s28_s10 = sadd.s32 1, %s1489_s10   ;;  %s1958_s27 = smov %s1473_s28 }
 0x5ad   : > { %p25_p5 = scmp.ge.s32.totalorder %s28_s10, 4   ;;  %s1959_s28 = smov %s1477_s29 }
 0x5ae   : > { %s1960_s29 = smov %s1720_s25  ;;  %s1961_s30 = smov %s1485_s9 }
 0x5af   : > { %s1962_s9 = smov %s1964_s18  ;;  %27 = sbr.rel (!%p25_p5) target bundleno = 15 (0xf), region = 130 }
 0x5b6   :  { %914 = vsyncpa [#allocation7], 1 }
 0x5b7   :  { %916 = vsyncpa [#allocation7 + $0x1], 1 }
 0x5b8   :  { %917 = vsyncpa [#allocation10], 1 }
 0x5b9   :  { %919 = vsyncpa [#allocation10 + $0x1], 1 }
 0x5ba   :  { %920 = vsyncpa [#allocation13], 1 }
 0x5bb   :  { %921 = vsyncpa [#allocation8], 1 }
 0x5bc   :  { %923 = vsyncpa [#allocation8 + $0x1], 1 }

// kernel: tpu_custom_call.1
= control target key start
LH: loop header
LB: loop body
LE: loop exit
PB: predicated region body
PF: predicated region fallthrough
CT: control target
= control target key end

     0   :  { %s1911_s0 = inlined_call_operand.hbm [shape: f32[2,8,32], index: 0, kind: input, shape index: {}]   ;;  %s1912_s1 = inlined_call_operand.hbm [shape: f32[2,8,32], index: 1, kind: input, shape index: {}]   ;;  %s1913_s2 = inlined_call_operand.hbm [shape: f32[32,32], index: 2, kind: input, shape index: {}]   ;;  %s1914_s3 = inlined_call_operand.vmem [shape: f32[1,32], index: 3, kind: input, shape index: {}]   ;;  %s1915_s4 = inlined_call_operand.hbm [shape: f32[32,64], index: 4, kind: input, shape index: {}]   ;;  %s1916_s5 = inlined_call_operand.vmem [shape: f32[1,64], index: 5, kind: input, shape index: {}]   ;;  %s1917_s6 = inlined_call_operand.hbm [shape: f32[32,32], index: 6, kind: input, shape index: {}]   ;;  %s1918_s7 = inlined_call_operand.vmem [shape: f32[1,32], index: 7, kind: input, shape index: {}]   ;;  %s1919_s8 = inlined_call_operand.hbm [shape: f32[2,8,32], index: 8, kind: output, shape index: {}]  }
   0x1   :  { %1927 = sst [smem:[#allocation23_spill]] %s1913_s2 }
   0x2   :  { %1928 = sst [smem:[#allocation24_spill]] %s1915_s4 }
   0x3   :  { %1929 = sst [smem:[#allocation25_spill]] %s1917_s6 }
   0x4   :  { %1930 = sst [smem:[#allocation26_spill]] %s1918_s7 }
   0x5   :  { %1931 = sst [smem:[#allocation27_spill]] %s1919_s8 }
   0x6   :  { %13 = vsyncpa [#allocation7], 0 }
   0x7   :  { %15 = vsyncpa [#allocation7 + $0x1], 0 }
   0x8   :  { %16 = vsyncpa [#allocation10], 0 }
   0x9   :  { %18 = vsyncpa [#allocation10 + $0x1], 0 }
   0xa   :  { %19 = vsyncpa [#allocation13], 0 }
   0xb   :  { %20 = vsyncpa [#allocation8], 0 }
   0xc   :  { %22 = vsyncpa [#allocation8 + $0x1], 0  ;;  %s1550_s27 = smov 0   ;;  %s1552_s28 = smov 0  }
   0xd   :  { %s1554_s29 = smov 0   ;;  %s1556_s30 = smov 0  }
   0xe   :  { %s1558_s9 = smov 0   ;;  %s1560_s10 = smov 0  }
   0xf LB: > { %1932 = sst [smem:[#allocation21_spill]] %s1469_s27  ;;  %s1581_s11 = sadd.s32 4294967295, %s1489_s10   ;;  %s1489_s10 = sphi %s1560_s10, %s28_s10   ;;  %s1485_s9 = sphi %s1558_s9, %s1962_s9   ;;  %s1481_s30 = sphi %s1556_s30, %s1961_s30   ;;  %s1477_s29 = sphi %s1554_s29, %s1960_s29   ;;  %s1473_s28 = sphi %s1552_s28, %s1959_s28   ;;  %s1469_s27 = sphi %s1550_s27, %s1958_s27  }
  0x10   : > { %s1027_s12 = sadd.s32 4294967294, %s1489_s10   ;;  %p60_p0 = scmp.ne.s32.totalorder %s1473_s28, %s1469_s27 }
  0x11   : > { %p1920_p1 = scmp.eq.s32.totalorder %s1581_s11, 0  ;;  %p244_p3 = scmp.eq.s32.totalorder %s1027_s12, 1 }
  0x12   : > { %p1028_p5 = scmp.ge.s32.totalorder %s1489_s10, 1  ;;  %p251_p7 = scmp.lt.s32.totalorder %s1489_s10, 3 }
  0x13   : > { %p1590_p4 = por %p1920_p1, %p60_p0  ;;  %p1595_p6 = por %p244_p3, %p60_p0 }
  0x14   : > { %p1600_p8 = pnand %p1028_p5, %p251_p7  ;;  %s1491_s16 = smov [#allocation11]  }
  0x15   : > { %s1933_s13 = scalar_select %p1590_p4, 1, 0 }
  0x16   : > { %s1934_s14 = scalar_select %p1595_p6, 1, 0 }
  0x17   : > { %s1936_s15 = scalar_select %p1600_p8, 1, 0 }
  0x18   : > { %1935 = sst [smem:[#allocation22_spill]] %s1934_s14  ;;  %s263_s17 = sshll.u32 %s1491_s16, 4  ;;  %s1604_s17 = int_to_ptr.vmem [resolvable:$true] %s263_s17 }
  0x19   : > { %p1155_p9 = pneg %p1600_p8  ;;  %s1492_s19 = smov [#allocation12]  }
  0x1a   : > { %s279_s20 = sshll.u32 %s1492_s19, 4  ;;  %s1493_s21 = smov [#allocation14]   ;;  %s1615_s20 = int_to_ptr.vmem [resolvable:$true] %s279_s20 }
  0x1b   : > { %p1611_p11 = pnand %p1155_p9, %p1920_p1  ;;  %s1617_s22 = sshll.u32 %s1493_s21, 4  ;;  %s296_s22 = int_to_ptr.vmem [resolvable:$true] %s1617_s22 }
  0x1c   : > { %s1938_s2 = sld [smem:[#allocation23_spill]] }
  0x1d   : > { %p1627_p13 = pneg %p1611_p11 }
  0x22   : > { %s1251_s25 = scalar_lea.hbm %s1938_s2, 512 }
  0x23   : > { %p1252_p12 = scmp.ne.s32.totalorder %s1938_s2, %s1251_s25  ;;  %p1258_p5 = scmp.lt.u32.totalorder %s1251_s25, %s1938_s2 }
  0x25   : > { %p1254_p0 = pnand %p1627_p13, %p1252_p12 }
  0x27   : > { %p1255_p3 = pneg %p1254_p0 }
  0x29   : > { %p1260_p7 = pnand %p1258_p5, %p1255_p3 }
  0x2b   : > { %1263 = shalt.err (!%p1260_p7)
}
  0x2c   : > { %s1264_s23 = scalar_lea.vmem %s1604_s17, 512  ;;  %p1272_p2 = scmp.lt.s32.totalorder %s1604_s17, %s1604_s17 }
  0x2d   : > { %p1265_p9 = scmp.ne.s32.totalorder %s1604_s17, %s1264_s23  ;;  %p1273_p6 = scmp.lt.s32.totalorder %s1264_s23, %s1264_s23 }
  0x2f   : > { %p1267_p10 = pnand %p1265_p9, %p1627_p13  ;;  %p1274_p12 = por %p1273_p6, %p1272_p2 }
  0x31   : > { %p1268_p1 = pneg %p1267_p10 }
  0x33   : > { %p1275_p0 = pnand %p1274_p12, %p1268_p1 }
  0x35   : > { %1278 = shalt.err (!%p1275_p0)
}
  0x36   : > { %s1494_s24 = smov 128   ;;  %s1495_s25 = smov 8  }
  0x37   : > { %1158 = dma.hbm_to_vmem [thread:$0]  (!%p1611_p11), %s1938_s2, 512, %s1604_s17, [#allocation10], %s1494_s24, %s1494_s24, %s1495_s25  }
  0x38   : > { %s1940_s4 = sld [smem:[#allocation24_spill]] }
  0x3e   : > { %s1279_s23 = scalar_lea.hbm %s1940_s4, 512 }
  0x3f   : > { %p1280_p1 = scmp.ne.s32.totalorder %s1940_s4, %s1279_s23  ;;  %p1286_p10 = scmp.lt.u32.totalorder %s1279_s23, %s1940_s4 }
  0x41   : > { %p1282_p2 = pnand %p1280_p1, %p1627_p13 }
  0x43   : > { %p1283_p6 = pneg %p1282_p2 }
  0x45   : > { %p1288_p3 = pnand %p1286_p10, %p1283_p6 }
  0x47   : > { %1291 = shalt.err (!%p1288_p3)
}
  0x48   : > { %s1292_s17 = scalar_lea.vmem %s1615_s20, 512  ;;  %p1300_p12 = scmp.lt.s32.totalorder %s1615_s20, %s1615_s20 }
  0x49   : > { %p1293_p5 = scmp.ne.s32.totalorder %s1615_s20, %s1292_s17  ;;  %p1301_p0 = scmp.lt.s32.totalorder %s1292_s17, %s1292_s17 }
  0x4b   : > { %p1295_p7 = pnand %p1293_p5, %p1627_p13  ;;  %p1302_p1 = por %p1301_p0, %p1300_p12 }
  0x4d   : > { %p1296_p9 = pneg %p1295_p7 }
  0x4f   : > { %p1303_p2 = pnand %p1302_p1, %p1296_p9 }
  0x51   : > { %1306 = shalt.err (!%p1303_p2)
}
  0x52   : > { %1161 = dma.hbm_to_vmem [thread:$0]  (!%p1611_p11), %s1940_s4, 512, %s1615_s20, [#allocation13], %s1494_s24, %s1494_s24, %s1495_s25  }
  0x53   : > { %s1941_s6 = sld [smem:[#allocation25_spill]] }
  0x59   : > { %s1307_s26 = scalar_lea.hbm %s1941_s6, 512 }
  0x5a   : > { %p1308_p6 = scmp.ne.s32.totalorder %s1941_s6, %s1307_s26  ;;  %p1314_p5 = scmp.lt.u32.totalorder %s1307_s26, %s1941_s6 }
  0x5c   : > { %p1310_p10 = pnand %p1308_p6, %p1627_p13 }
  0x5e   : > { %p1311_p3 = pneg %p1310_p10 }
  0x60   : > { %p1316_p7 = pnand %p1314_p5, %p1311_p3 }
  0x62   : > { %1319 = shalt.err (!%p1316_p7)
}
  0x63   : > { %s1320_s17 = scalar_lea.vmem %s296_s22, 512  ;;  %p1328_p1 = scmp.lt.s32.totalorder %s296_s22, %s296_s22 }
  0x64   : > { %p1321_p9 = scmp.ne.s32.totalorder %s296_s22, %s1320_s17  ;;  %p1329_p2 = scmp.lt.s32.totalorder %s1320_s17, %s1320_s17 }
  0x66   : > { %p1323_p12 = pnand %p1321_p9, %p1627_p13  ;;  %p1330_p4 = por %p1329_p2, %p1328_p1 }
  0x68   : > { %p1324_p0 = pneg %p1323_p12 }
  0x6a   : > { %p1331_p8 = pnand %p1330_p4, %p1324_p0 }
  0x6c   : > { %1334 = shalt.err (!%p1331_p8)
}
  0x6d   : > { %1164 = dma.hbm_to_vmem [thread:$0]  (!%p1611_p11), %s1941_s6, 512, %s296_s22, [#allocation13], %s1494_s24, %s1494_s24, %s1495_s25  }
  0x6e   : > { %s47_s16 = sadd.s32 1, %s1477_s29  ;;  %s40_s18 = sadd.s32 1, %s1485_s9 }
  0x6f   : > { %p54_p4 = scmp.ne.s32.totalorder %s1477_s29, %s1473_s28  ;;  %p42_p8 = scmp.ge.s32.totalorder %s40_s18, 2 }
  0x70   : > { %p55_p13 = scmp.eq.s32.totalorder %s1489_s10, 0  ;;  %p1942_p6 = scmp.eq.s32.totalorder %s1581_s11, 1 }
  0x71   : > { %p1179_p3 = scmp.lt.s32.totalorder %s1489_s10, 2  ;;  %s1964_s18 = smov (%p42_p8, %s40_s18), 0 }
  0x72   : > { %p1706_p10 = por %p1942_p6, %p54_p4  ;;  %p56_p5 = por %p55_p13, %p54_p4 }
  0x73   : > { %s312_s27 = sand.u32 1, %s1477_s29   ;;  %s44_s14 = ssub.s32 %s1485_s9, %s1964_s18 }
  0x74   : > { %s1943_s8 = scalar_select %p1706_p10, 1, 0 }
  0x75   : > { %p45_p11 = scmp.eq.s32.totalorder %s44_s14, 0  ;;  %s1716_s22 = sshll.u32 %s312_s27, 3 }
  0x76   : > { %s1034_s24 = sshll.u32 %s1485_s9, 7  ;;  %s316_s21 = scalar_lea.vmem [#allocation6], %s1716_s22 }
  0x77   : > { %s1720_s25 = scalar_select %p45_p11, %s1477_s29, %s47_s16  }
  0x78   : > { %s1725_s19 = scalar_lea.hbm %s1911_s0, %s1034_s24  ;;  %s323_s23 = sshll.u32 %s316_s21, 4  ;;  %s1728_s23 = int_to_ptr.vmem [resolvable:$true] %s323_s23 }
  0x79   : > { %p1732_p7 = pnand %p1179_p3, %p56_p5  ;;  %s1739_s16 = scalar_lea.hbm %s1912_s1, %s1034_s24 }
  0x7a   : > { %s330_s14 = sand.u32 1, %s1489_s10   ;;  %s313_s26 = scalar_lea.sflag [#allocation7], %s312_s27 }
  0x7b   : > { %s1335_s12 = scalar_lea.hbm %s1725_s19, 128  ;;  %p1337_p12 = pneg %p1732_p7 }
  0x7c   : > { %p1336_p9 = scmp.ne.s32.totalorder %s1725_s19, %s1335_s12  ;;  %s1340_s4 = scalar_lea.hbm %s1911_s0, 256 }
  0x7d   : > { %p1341_p2 = scmp.lt.u32.totalorder %s1725_s19, %s1911_s0  ;;  %p1342_p4 = scmp.lt.u32.totalorder %s1340_s4, %s1335_s12 }
  0x7e   : > { %p1338_p0 = pnand %p1337_p12, %p1336_p9  ;;  %p1344_p13 = scmp.lt.u32.totalorder %s1335_s12, %s1725_s19 }
  0x7f   : > { %p1343_p8 = por %p1342_p4, %p1341_p2 }
  0x80   : > { %p1339_p1 = pneg %p1338_p0 }
  0x81   : > { %p1345_p6 = por %p1344_p13, %p1343_p8 }
  0x83   : > { %p1346_p3 = pnand %p1345_p6, %p1339_p1 }
  0x85   : > { %1349 = shalt.err (!%p1346_p3)
}
  0x86   : > { %s1350_s27 = scalar_lea.vmem %s1728_s23, 128  ;;  %s1496_s2 = smov [#allocation6]  }
  0x87   : > { %p1351_p5 = scmp.ne.s32.totalorder %s1728_s23, %s1350_s27  ;;  %s1355_s24 = sshll.u32 %s1496_s2, 4  ;;  %s1356_s24 = int_to_ptr.vmem [resolvable:$false] %s1355_s24 }
  0x88   : > { %s1357_s6 = scalar_lea.vmem %s1356_s24, 256  ;;  %p1358_p0 = scmp.lt.s32.totalorder %s1728_s23, %s1356_s24 }
  0x89   : > { %p1353_p11 = pnand %p1351_p5, %p1337_p12  ;;  %p1359_p2 = scmp.lt.s32.totalorder %s1357_s6, %s1350_s27 }
  0x8b   : > { %p1354_p9 = pneg %p1353_p11  ;;  %p1360_p4 = por %p1359_p2, %p1358_p0 }
  0x8d   : > { %p1361_p8 = pnand %p1360_p4, %p1354_p9 }
  0x8f   : > { %1364 = shalt.err (!%p1361_p8)
}
  0x90   : > { %1168 = dma.hbm_to_vmem [thread:$0]  (!%p1732_p7), %s1725_s19, 128, %s1728_s23, %s313_s26  }
  0x91   : > { %s334_s4 = scalar_lea.vmem [#allocation9], %s1716_s22  ;;  %s331_s12 = scalar_lea.sflag [#allocation10], %s330_s14 }
  0x92   : > { %s342_s7 = sshll.u32 %s334_s4, 4  ;;  %s1365_s21 = scalar_lea.hbm %s1739_s16, 128  ;;  %s343_s7 = int_to_ptr.vmem [resolvable:$true] %s342_s7 }
  0x93   : > { %p1366_p1 = scmp.ne.s32.totalorder %s1739_s16, %s1365_s21  ;;  %s1370_s2 = scalar_lea.hbm %s1912_s1, 256 }
  0x94   : > { %p1371_p3 = scmp.lt.u32.totalorder %s1739_s16, %s1912_s1  ;;  %p1372_p5 = scmp.lt.u32.totalorder %s1370_s2, %s1365_s21 }
  0x95   : > { %p1368_p13 = pnand %p1366_p1, %p1337_p12  ;;  %p1374_p9 = scmp.lt.u32.totalorder %s1365_s21, %s1739_s16 }
  0x96   : > { %p1373_p11 = por %p1372_p5, %p1371_p3 }
  0x97   : > { %p1369_p6 = pneg %p1368_p13 }
  0x98   : > { %p1375_p0 = por %p1374_p9, %p1373_p11 }
  0x9a   : > { %p1376_p2 = pnand %p1375_p0, %p1369_p6 }
  0x9c   : > { %1379 = shalt.err (!%p1376_p2)
}
  0x9d   : > { %s1380_s22 = scalar_lea.vmem %s343_s7, 128  ;;  %s1497_s19 = smov [#allocation9]  }
  0x9e   : > { %p1381_p4 = scmp.ne.s32.totalorder %s343_s7, %s1380_s22  ;;  %s1385_s23 = sshll.u32 %s1497_s19, 4  ;;  %s1386_s23 = int_to_ptr.vmem [resolvable:$false] %s1385_s23 }
  0x9f   : > { %s1387_s14 = scalar_lea.vmem %s1386_s23, 256  ;;  %p1388_p13 = scmp.lt.s32.totalorder %s343_s7, %s1386_s23 }
  0xa0   : > { %p1383_p8 = pnand %p1381_p4, %p1337_p12  ;;  %p1389_p10 = scmp.lt.s32.totalorder %s1387_s14, %s1380_s22 }
  0xa2   : > { %p1384_p1 = pneg %p1383_p8  ;;  %p1390_p3 = por %p1389_p10, %p1388_p13 }
  0xa4   : > { %p1391_p5 = pnand %p1390_p3, %p1384_p1 }
  0xa6   : > { %1394 = shalt.err (!%p1391_p5)
}
  0xa7   : > { %1171 = dma.hbm_to_vmem [thread:$0]  (!%p1732_p7), %s1739_s16, 128, %s343_s7, %s331_s12  }
  0xa8   : > { %p1945_p6 = scmp.ne.s32.totalorder %s1936_s15, 0 }
  0xa9   : > { %s1792_s26 = sand.u32 (!%p1945_p6), 1, %s1473_s28   ;;  %p1946_p10 = scmp.ne.s32.totalorder (!%p1945_p6), %s1933_s13, 0 }
  0xaa   : > { %351 = sbr.rel (%p1945_p6) target bundleno = 1441 (0x5a1), region = 52  ;;  %s1795_s4 = sshll.u32 (!%p1945_p6), %s1792_s26, 3 }
  0xab   : > { %s354_s21 = scalar_lea.sflag (!%p1945_p6), [#allocation7], %s1792_s26  ;;  %s357_s20 = scalar_lea.vmem (!%p1945_p6), [#allocation6], %s1795_s4 }
  0xb1   : > { %1448 = dma.done.wait (%p1946_p10), %s354_s21, 128  }
  0xb2   : > { %1450 = vsyncadd (%p1946_p10), %s354_s21, 4294967168  ;;  %s362_s15 = sand.u32 1, %s1581_s11   ;;  %s366_s16 = scalar_lea.vmem [#allocation9], %s1795_s4 }
  0xb3   : > { %s363_s17 = scalar_lea.sflag [#allocation10], %s362_s15 }
  0xb4   : > { %1452 = dma.done.wait (%p1946_p10), %s363_s17, 128  }
  0xb5   : > { %1454 = vsyncadd (%p1946_p10), %s363_s17, 4294967168  ;;  %p1947_p7 = scmp.eq.s32.totalorder %s1581_s11, 0 }
  0xb7   : > { %1456 = dma.done.wait (%p1947_p7), [#allocation10], 512   ;;  %p1948_p12 = pmov %p1947_p7 }
  0xb8   : > { %p1949_p11 = pmov %p1947_p7 }
  0xb9   : > { %1458 = vsyncadd (%p1948_p12), [#allocation10], 4294966784 }
  0xba   : > { %1460 = dma.done.wait (%p1949_p11), [#allocation13], 1024   ;;  %p1950_p9 = pmov %p1947_p7 }
  0xbb   : > { %vm432_vm0 = vcmask 261120   ;;  %v1498_v0 = vmov 0.0|0.0   ;;  %v1499_v1 = vmov 0.0   ;;  %vm1500_vm1 = vmmov 0   ;;  %v421_v2 = vld [vmem:[#allocation11] sm:$0xff]  ;;  %v422_v3 = vld [vmem:[#allocation11 + $0x8] sm:$0xff] }
  0xbc   : > { %1462 = vsyncadd (%p1950_p9), [#allocation13], 4294966272  ;;  %1119 = vmatprep.subr.bf16.mxu0 %v1498_v0  ;;  %1125 = vmatprep.subr.bf16.mxu1 %v1498_v0  ;;  %510 = vst.msk [vmem:[#allocation5] sm:$0xff] %vm432_vm0, %v1499_v1  ;;  %v512_v4 = vld [vmem:[#allocation12] sm:$0xff]  ;;  %v1120_v5 = vpack.c.bf16 %v422_v3, %v421_v2  ;;  %v513_v6 = vld [vmem:[#allocation12 + $0x8] sm:$0xff]  ;;  %s1501_s27 = smov 96  }
  0xbd   : > { %1084 = vmatprep.mubr.msk.f32.mxu0 %vm1500_vm1, %v1499_v1  ;;  %1095 = vmatprep.mubr.msk.f32.mxu1 %vm1500_vm1, %v1499_v1  ;;  %v423_v7 = vld [vmem:[#allocation11 + $0x10] sm:$0xff]  ;;  %v424_v8 = vld [vmem:[#allocation11 + $0x18] sm:$0xff]  ;;  %v1126_v9 = vpack.c.bf16 %v513_v6, %v512_v4  ;;  %v420_v14 = vld [vmem:[%s357_s20] sm:$0xff]  ;;  %vm507_vm2 = vcmask 7168   ;;  %v1502_v25 = vmov -inf   ;;  %vm675_vm3 = vcmask 64512  }
  0xbe   : > { %v514_v10 = vld [vmem:[#allocation12 + $0x10] sm:$0xff]  ;;  %v515_v11 = vld [vmem:[#allocation12 + $0x18] sm:$0xff]  ;;  %1121 = vmatpush3.bf16.msra.mxu0 %v1120_v5  ;;  %v1123_v12 = vpack.c.bf16 %v424_v8, %v423_v7  ;;  %v1044_v16 = vld [vmem:[%s1914_s3] ss:$0 sm:$0xff]  ;;  %508 = vst.msk [vmem:[#allocation3] sm:$0xff] %vm507_vm2, %v1502_v25  ;;  %v1503_v30 = vmov 0  }
  0xbf   : > { %1122 = vmatprep.subr.bf16.mxu0 %v1498_v0  ;;  %1127 = vmatpush3.bf16.msra.mxu1 %v1126_v9  ;;  %v1129_v13 = vpack.c.bf16 %v515_v11, %v514_v10  ;;  %v511_v15 = vld [vmem:[%s366_s16] sm:$0xff]  ;;  %v1046_v17 = vld [vmem:[%s1916_s5] ss:$0 sm:$0xff]  ;;  %509 = vst.msk [vmem:[#allocation4] sm:$0xff] %vm507_vm2, %v1499_v1  ;;  %v798_v48 = vld [vmem:[#allocation14 + $0x8] sm:$0xff]  ;;  %s1951_s6 = sld [smem:[#allocation26_spill]] }
  0xc0   : > { %1128 = vmatprep.subr.bf16.mxu1 %v1498_v0  ;;  %1243 = vset.pattern.permute.xlu0 %v1503_v30  ;;  %v797_v47 = vld [vmem:[#allocation14] sm:$0xff]  ;;  %v799_v50 = vld [vmem:[#allocation14 + $0x10] sm:$0xff]  ;;  %v800_v51 = vld [vmem:[#allocation14 + $0x18] sm:$0xff]  ;;  %s1054_s22 = sshll.u32 %s1481_s30, 7  ;;  %s415_s19 = scalar_lea.vmem [#allocation15], %s1795_s4 }
  0xc1   : > { %1244 = vset.pattern.permute.xlu1 %v1503_v30  ;;  %v1132_v49 = vpack.c.bf16 %v798_v48, %v797_v47  ;;  %v1135_v52 = vpack.c.bf16 %v800_v51, %v799_v50  ;;  %s896_s23 = sshll.u32 %s415_s19, 4  ;;  %s1952_s20 = sld [smem:[#allocation27_spill]]  ;;  %s1863_s23 = int_to_ptr.vmem [resolvable:$true] %s896_s23 }
  0xc2   : > { %1124 = vmatpush3.bf16.msra.mxu0 %v1123_v12  ;;  %s883_s17 = scalar_lea.sflag [#allocation8], %s1792_s26  ;;  %s1395_s16 = scalar_lea.vmem %s1863_s23, 128 }
  0xc3   : > { %1130 = vmatpush3.bf16.msra.mxu1 %v1129_v13  ;;  %1131 = vmatprep.subr.bf16.mxu0 %v1498_v0  ;;  %v699_v53 = vld [vmem:[#allocation5] sm:$0xff]  ;;  %p1396_p0 = scmp.ne.s32.totalorder %s1863_s23, %s1395_s16  ;;  %p1953_p2 = scmp.ne.s32.totalorder %s1943_s8, 0 }
  0xc4   : > { %1098 = vmatprep.subr.mxu1 %v1499_v1  ;;  %s1504_s30 = smov [#allocation15]  }
  0xc5   : > { %1085 = vmatmul.mubr.msk.f32.vlgmr.msra.gmra.mrb[0].mxu0 %vm432_vm0, %v420_v14  ;;  %v674_v31 = vld [vmem:[#allocation3] sm:$0xff]  ;;  %v1051_v63 = vld [vmem:[%s1951_s6] ss:$0 sm:$0xff]  ;;  %p1397_p4 = pnand %p1396_p0, %p1953_p2  ;;  %s1399_s4 = sshll.u32 %s1504_s30, 4  ;;  %s1400_s4 = int_to_ptr.vmem [resolvable:$false] %s1399_s4 }
  0xc6   : > { %1096 = vmatmul.mubr.msk.f32.vlgmr.msra.gmra.mrb[0].mxu1 %vm432_vm0, %v511_v15  ;;  %1116 = vmatprep.mubr.msk.f32.mxu0 %vm1500_vm1, %v1499_v1  ;;  %v691_v42 = vld [vmem:[#allocation4] sm:$0xff]  ;;  %s1401_s11 = scalar_lea.vmem %s1400_s4, 256  ;;  %p1402_p1 = scmp.lt.s32.totalorder %s1863_s23, %s1400_s4 }
  0xc7   : > { %1100 = vmatprep.mubr.msk.f32.mxu1 %vm1500_vm1, %v1499_v1  ;;  %1133 = vmatpush3.bf16.msra.mxu0 %v1132_v49  ;;  %s1861_s15 = scalar_lea.hbm %s1952_s20, %s1054_s22  ;;  %p1398_p8 = pneg %p1397_p4 }
  0xc8   : > { %1134 = vmatprep.subr.bf16.mxu0 %v1498_v0  ;;  %p1403_p13 = scmp.lt.s32.totalorder %s1401_s11, %s1395_s16 }
  0xca   : > { %p1404_p3 = por %p1403_p13, %p1402_p1 }
  0xcb   : > { %1136 = vmatpush3.bf16.msra.mxu0 %v1135_v52 }
  0xcc   : > { %p1405_p5 = pnand %p1404_p3, %p1398_p8 }
 0x198   : > { %v502_v18 = vpop.f32.mrb[0].mxu0 }
 0x199   : > { %v503_v19 = vadd.f32 %v1044_v16, %v502_v18  ;;  %v1086_v20 = vpop.f32.mrb[1].mxu0  ;;  %v593_v21 = vpop.f32.mrb[0].mxu1 }
 0x19a   : > { %v594_v22 = vadd.f32 %v1046_v17, %v593_v21  ;;  %v1097_v23 = vpop.f32.mrb[1].mxu1 }
 0x19b   : > { %506 = vst.msk [vmem:[#allocation2] sm:$0xff] %vm432_vm0, %v503_v19 }
 0x19c   : > { %706 = vrot.lane.b32.xlu1 %v594_v22, %s1501_s27  ;;  %1099 = vmatpush3.xpose.msk.msra.mxu1 %vm432_vm0, %v594_v22 }
 0x19d   : > { %1103 = vmatprep.subr.mxu1 %v1499_v1 }
 0x1a2   : > { %v597_v24 = vld [vmem:[#allocation2] sm:$0xff] }
 0x1a3   : > { %1101 = vmatmul.mubr.msk.f32.vlgmr.msra.gmra.mrb[2].mxu1 %vm432_vm0, %v597_v24 }
 0x1a4   : > { %1105 = vmatprep.mubr.msk.f32.mxu1 %vm1500_vm1, %v1499_v1 }
 0x20e   : > { %v707_v26 = vpop.permute.xlu1 %706 }
 0x20f   : > { %1104 = vmatpush3.msra.mxu1 %v707_v26 }
 0x276   : > { %v670_v27 = vpop.f32.mrb[2].mxu1 }
 0x277   : > { %v1102_v28 = vpop.f32.mrb[3].mxu1  ;;  %v676_v29 = vsel %vm675_vm3, %v670_v27, -inf }
 0x278   : > { %677 = vmax.xlane.f32.xlu0 %v676_v29 }
 0x305   : > { %v678_v32 = vpop.xlane.xlu0 %677 }
 0x306   : > { %v679_v33 = vmax.f32 %v674_v31, %v678_v32 }
 0x308   : > { %v680_v34 = vsub.f32 %v674_v31, %v679_v33  ;;  %784 = vst.msk [vmem:[#allocation3] sm:$0xff] %vm507_vm2, %v679_v33  ;;  %685 = vperm.xlu0 %1243, %v679_v33  }
 0x30a   : > { %v681_v40 = vmul.f32 1.442695, %v680_v34 }
 0x387   : > { %v686_v35 = vpop.permute.xlu0 %685 }
 0x388   : > { %v688_v36 = vsub.f32 %v670_v27, %v686_v35 }
 0x38a   : > { %v689_v37 = vmul.f32 1.442695, %v688_v36 }
 0x38c   : > { %1245 = vpow2.f32 %v689_v37 }
 0x38d   : > { %1247 = vpow2.f32 %v681_v40 }
 0x396   : > { %v1246_v38 = vpop.eup %1245 }
 0x397   : > { %1106 = vmatmul.mubr.msk.f32.vlgmr.msra.gmra.mrb[4].mxu1 %vm675_vm3, %v1246_v38  ;;  %v693_v39 = vsel %vm675_vm3, %v1246_v38, 0.0  ;;  %v1248_v41 = vpop.eup %1247 }
 0x398   : > { %694 = vadd.xlane.f32.xlu1 %v693_v39  ;;  %v692_v43 = vmul.f32 %v1248_v41, %v691_v42 }
 0x3a9   : > { %702 = vperm.xlu1 %1244, %v1248_v41  }
 0x425   : > { %v695_v44 = vpop.xlane.xlu1 %694 }
 0x426   : > { %v696_v45 = vadd.f32 %v695_v44, %v692_v43 }
 0x428   : > { %698 = vst.msk [vmem:[#allocation4] sm:$0xff] %vm507_vm2, %v696_v45 }
 0x429   : > { %v703_v54 = vpop.permute.xlu1 %702 }
 0x42a   : > { %v705_v55 = vmul.f32 %v703_v54, %v699_v53 }
 0x42f   : > { %v789_v46 = vld [vmem:[#allocation4] sm:$0xff] }
 0x430   : > { %792 = vperm.xlu0 %1243, %v789_v46  }
 0x46a   : > { %v778_v56 = vpop.f32.mrb[4].mxu1 }
 0x46b   : > { %v782_v57 = vadd.f32 %v778_v56, %v705_v55  ;;  %v1107_v58 = vpop.f32.mrb[5].mxu1 }
 0x46d   : > { %783 = vst.msk [vmem:[#allocation5] sm:$0xff] %vm432_vm0, %v782_v57 }
 0x474   : > { %v788_v61 = vld [vmem:[#allocation5] sm:$0xff] }
 0x4af   : > { %v793_v59 = vpop.permute.xlu0 %792 }
 0x4b0   : > { %1249 = vrcp.f32 %v793_v59 }
 0x4ba   : > { %v1250_v60 = vpop.eup %1249 }
 0x4bb   : > { %v796_v62 = vmul.f32 %v1250_v60, %v788_v61 }
 0x4bd   : > { %1117 = vmatmul.mubr.msk.f32.vlgmr.msra.gmra.mrb[2].mxu0 %vm432_vm0, %v796_v62 }
 0x590   : > { %v877_v0 = vpop.f32.mrb[2].mxu0 }
 0x591   : > { %v878_v1 = vadd.f32 %v1051_v63, %v877_v0  ;;  %v1118_v2 = vpop.f32.mrb[3].mxu0 }
 0x593   : > { %881 = vst.msk [vmem:[%s415_s19] sm:$0xff] %vm432_vm0, %v878_v1 }
 0x594   : > { %1408 = shalt.err (!%p1405_p5)
}
 0x595   : > { %s1409_s26 = scalar_lea.hbm %s1861_s15, 128  ;;  %s1413_s12 = scalar_lea.hbm %s1952_s20, 256 }
 0x596   : > { %p1410_p6 = scmp.ne.s32.totalorder %s1861_s15, %s1409_s26  ;;  %p1414_p12 = scmp.lt.u32.totalorder %s1861_s15, %s1952_s20 }
 0x597   : > { %p1415_p11 = scmp.lt.u32.totalorder %s1413_s12, %s1409_s26  ;;  %p1417_p0 = scmp.lt.u32.totalorder %s1409_s26, %s1861_s15 }
 0x598   : > { %p1411_p10 = pnand %p1410_p6, %p1953_p2 }
 0x599   : > { %p1416_p9 = por %p1415_p11, %p1414_p12 }
 0x59a   : > { %p1412_p7 = pneg %p1411_p10 }
 0x59b   : > { %p1418_p4 = por %p1417_p0, %p1416_p9 }
 0x59d   : > { %p1419_p8 = pnand %p1418_p4, %p1412_p7 }
 0x59f   : > { %1422 = shalt.err (!%p1419_p8)
}
 0x5a0   : > { %1153 = dma.vmem_to_hbm [thread:$0]  (%p1953_p2), %s1863_s23, 128, %s1861_s15, %s883_s17  }
 0x5a1 PF: > { %s1954_s24 = sld [smem:[#allocation21_spill]]  ;;  %s1955_s6 = sld [smem:[#allocation22_spill]] }
 0x5a2   : > { %p1957_p13 = scmp.ge.s32.totalorder %s1489_s10, 2 }
 0x5a7   : > { %s908_s22 = sand.u32 1, %s1954_s24   ;;  %p1956_p1 = scmp.ne.s32.totalorder %s1955_s6, 0 }
 0x5a8   : > { %s909_s19 = scalar_lea.sflag [#allocation8], %s908_s22 }
 0x5a9   : > { %p1173_p3 = pnand %p1957_p13, %p1956_p1 }
 0x5ab   : > { %1464 = dma.done.wait (!%p1173_p3), %s909_s19, 128  }
 0x5ac   : > { %1466 = vsyncadd (!%p1173_p3), %s909_s19, 4294967168  ;;  %s28_s10 = sadd.s32 1, %s1489_s10   ;;  %s1958_s27 = smov %s1473_s28 }
 0x5ad   : > { %p25_p5 = scmp.ge.s32.totalorder %s28_s10, 4   ;;  %s1959_s28 = smov %s1477_s29 }
 0x5ae   : > { %s1960_s29 = smov %s1720_s25  ;;  %s1961_s30 = smov %s1485_s9 }
 0x5af   : > { %s1962_s9 = smov %s1964_s18  ;;  %27 = sbr.rel (!%p25_p5) target bundleno = 15 (0xf), region = 130 }
 0x5b6   :  { %914 = vsyncpa [#allocation7], 1 }
 0x5b7   :  { %916 = vsyncpa [#allocation7 + $0x1], 1 }
 0x5b8   :  { %917 = vsyncpa [#allocation10], 1 }
 0x5b9   :  { %919 = vsyncpa [#allocation10 + $0x1], 1 }
 0x5ba   :  { %920 = vsyncpa [#allocation13], 1 }
 0x5bb   :  { %921 = vsyncpa [#allocation8], 1 }
 0x5bc   :  { %923 = vsyncpa [#allocation8 + $0x1], 1 }

</bundles_post_ra>
